<compile_context>
chip_gen: v7x
topology: tpu7x:2x2x1
jax: 0.10.0
libtpu: 0.0.40
codegen_flags: <defaults>
</compile_context>

<pallas_src>
import functools
import math

import jax
import jax.numpy as jnp
from jax.experimental import pallas as pl
from jax.experimental.pallas import tpu as pltpu

_VMEM_LIMIT = 32 * 1024 * 1024


def _round_up(x, m):
    return (x + m - 1) // m * m


# ----------------------------------------------------------------------------
# fused (multi-part) matmul + BN(scale,bias) + SiLU kernel  (the Conv hot path)
# ----------------------------------------------------------------------------
@functools.lru_cache(maxsize=None)
def _build_fused_matmul(mp, n_pad, ks, tm, tn):
    """silu((sum_p A_p @ B_p) * scale + bias); A_p (mp,ks[p]) bf16, B_p (ks[p],n_pad) bf16."""
    num_parts = len(ks)

    def kernel(*refs):
        a_refs = refs[:num_parts]
        b_refs = refs[num_parts:2 * num_parts]
        s_ref = refs[2 * num_parts]
        t_ref = refs[2 * num_parts + 1]
        o_ref = refs[2 * num_parts + 2]
        acc = jnp.dot(a_refs[0][...], b_refs[0][...],
                      preferred_element_type=jnp.float32)
        for p_i in range(1, num_parts):
            acc += jnp.dot(a_refs[p_i][...], b_refs[p_i][...],
                           preferred_element_type=jnp.float32)
        y = acc * s_ref[...] + t_ref[...]
        # SiLU: exp + approx reciprocal both live on the EUP slot.
        o_ref[...] = (y * pl.reciprocal(1.0 + jnp.exp(-y), approx=True)
                      ).astype(o_ref.dtype)

    in_specs = [pl.BlockSpec((tm, k), lambda i, j: (i, 0)) for k in ks]
    in_specs += [pl.BlockSpec((k, tn), lambda i, j: (0, j)) for k in ks]
    in_specs += [pl.BlockSpec((1, tn), lambda i, j: (0, j)),
                 pl.BlockSpec((1, tn), lambda i, j: (0, j))]

    return pl.pallas_call(
        kernel,
        out_shape=jax.ShapeDtypeStruct((mp, n_pad), jnp.bfloat16),
        grid_spec=pltpu.PrefetchScalarGridSpec(
            num_scalar_prefetch=0,
            grid=(mp // tm, n_pad // tn),
            in_specs=in_specs,
            out_specs=pl.BlockSpec((tm, tn), lambda i, j: (i, j)),
        ),
        compiler_params=pltpu.CompilerParams(
            dimension_semantics=("parallel", "parallel"),
            vmem_limit_bytes=_VMEM_LIMIT),
    )


def fused_matmul_bn_silu(a_parts, w_parts, scale, bias, n_out):
    """silu((concat_K(a_parts) @ concat_K(w_parts)) * scale + bias)[:, :n_out]."""
    m = a_parts[0].shape[0]
    n_pad = scale.shape[1]
    ks = tuple(int(w.shape[0]) for w in w_parts)
    ksum = sum(ks)

    # --- M tiling: pick the tile first, then pad M up to it.
    if ksum <= 64:
        tm_cap = 2048          # tiny-K layers (stem): amortize per-step overhead
    elif ksum <= 512:
        tm_cap = 1024
    else:
        tm_cap = 512
    mp8 = _round_up(m, 8)
    if mp8 <= tm_cap:
        tm = mp8
    else:
        tm = tm_cap
        while tm > 64 and (-mp8) % tm > mp8 // 8:     # keep pad waste small
            tm //= 2
    mp = _round_up(mp8, tm)
    mt = mp // tm

    # --- N tiling (n_pad is always a multiple of 128, pre-padded in params).
    tn = 128
    for cand in (512, 256, 128):
        if n_pad % cand == 0:
            tn = cand
            break
    # v7x megacore: make sure at least one parallel axis has >= 2 blocks.
    if mt == 1 and n_pad // tn == 1:
        if n_pad >= 256 and (n_pad // 2) % 128 == 0:
            tn = n_pad // 2
        elif tm >= 16 and (tm // 2) % 8 == 0:
            tm //= 2
            mt = mp // tm

    a_parts = [a.astype(jnp.bfloat16) for a in a_parts]
    if mp != m:
        a_parts = [jnp.pad(a, ((0, mp - m), (0, 0))) for a in a_parts]

    out = _build_fused_matmul(mp, n_pad, ks, tm, tn)(*a_parts, *w_parts, scale, bias)
    if mp != m or n_out != n_pad:
        out = out[:m, :n_out]
    return out


# ----------------------------------------------------------------------------
# 2x2 max-pool (stride 2): tiled kernel over a free reshape, no extra copies
# ----------------------------------------------------------------------------
def _maxpool_kernel(x_ref, o_ref):
    v = x_ref[...]                               # (tb, 2, wo, 2*c)
    row = jnp.maximum(v[:, 0], v[:, 1])          # max over the two H rows
    c = row.shape[-1] // 2
    o_ref[...] = jnp.maximum(row[:, :, :c], row[:, :, c:]).astype(o_ref.dtype)


@functools.lru_cache(maxsize=None)
def _build_maxpool(nho, wo, c, tb):
    return pl.pallas_call(
        _maxpool_kernel,
        out_shape=jax.ShapeDtypeStruct((nho, wo, c), jnp.bfloat16),
        grid_spec=pltpu.PrefetchScalarGridSpec(
            num_scalar_prefetch=0,
            grid=(nho // tb,),
            in_specs=[pl.BlockSpec((tb, 2, wo, 2 * c), lambda i: (i, 0, 0, 0))],
            out_specs=pl.BlockSpec((tb, wo, c), lambda i: (i, 0, 0)),
        ),
        compiler_params=pltpu.CompilerParams(
            dimension_semantics=("parallel",),
            vmem_limit_bytes=_VMEM_LIMIT),
    )


def maxpool2x2(x):
    n, h, w, c = x.shape
    ho, wo = h // 2, w // 2
    nho = n * ho
    x4 = x.reshape(nho, 2, wo, 2 * c)            # pure reshape, no data movement
    tb = 1
    for cand in (64, 32, 16, 8, 4, 2, 1):
        if nho % cand == 0 and cand * 2 * wo * 2 * c * 2 <= 4 * 1024 * 1024:
            tb = cand
            break
    out = _build_maxpool(nho, wo, c, tb)(x4)
    return out.reshape(n, ho, wo, c)


# ----------------------------------------------------------------------------
# Conv wrappers
# ----------------------------------------------------------------------------
def _im2col(x, k, s):
    """(N,H,W,C) bf16 -> (N*Ho*Wo, k*k*C) patches, channel order (kh, kw, c)."""
    n, h, w, c = x.shape
    p = k // 2                                   # autopad for odd k
    xp = jnp.pad(x, ((0, 0), (p, p), (p, p), (0, 0)))
    ho = (h + 2 * p - k) // s + 1
    wo = (w + 2 * p - k) // s + 1
    cols = [xp[:, dh:dh + s * ho:s, dw:dw + s * wo:s, :]
            for dh in range(k) for dw in range(k)]
    cols = jnp.concatenate(cols, axis=-1)
    return cols.reshape(n * ho * wo, k * k * c), (n, ho, wo)


def conv1x1_multi(parts, p):
    """Fused 1x1 Conv+BN+SiLU over a channel-partitioned NHWC input."""
    n, h, w, _ = parts[0].shape
    m = n * h * w
    flat = [q.reshape(m, q.shape[-1]) for q in parts]
    out = fused_matmul_bn_silu(flat, p["w_parts"], p["scale"], p["bias"], p["c2"])
    return out.reshape(n, h, w, p["c2"])


def conv_bn_silu(x, p):
    """Conv(k,s)+BN+SiLU on a single NHWC tensor."""
    k, s = p["k"], p["s"]
    if k == 1 and s == 1:
        return conv1x1_multi([x], p)
    cols, (n, ho, wo) = _im2col(x, k, s)
    out = fused_matmul_bn_silu([cols], p["w_parts"], p["scale"], p["bias"], p["c2"])
    return out.reshape(n, ho, wo, p["c2"])


# ----------------------------------------------------------------------------
# deterministic parameters: Conv2d(no bias) + folded BatchNorm, pre-packed
# ----------------------------------------------------------------------------
def _fold_conv(key, c1, c2, k, s=1, in_splits=None):
    kw_, kg, kb, km, kv = jax.random.split(key, 5)
    fan_in = c1 * k * k
    w = jax.random.normal(kw_, (c2, c1, k, k), jnp.float32) * math.sqrt(2.0 / fan_in)
    gamma = 1.0 + 0.1 * jax.random.normal(kg, (c2,), jnp.float32)
    beta = 0.1 * jax.random.normal(kb, (c2,), jnp.float32)
    mean = 0.1 * jax.random.normal(km, (c2,), jnp.float32)
    var = 1.0 + 0.1 * jax.random.uniform(kv, (c2,), jnp.float32)
    scale = gamma / jnp.sqrt(var + 1e-3)                  # BN eps = 0.001
    bias = beta - mean * scale

    n_pad = _round_up(c2, 128)
    # (cout,cin,kh,kw) -> (kh,kw,cin,cout) -> (k*k*cin, cout); pad N; cast bf16.
    w2 = jnp.transpose(w, (2, 3, 1, 0)).reshape(k * k * c1, c2)
    w2 = jnp.pad(w2, ((0, 0), (0, n_pad - c2))).astype(jnp.bfloat16)
    if in_splits is None:
        in_splits = (c1,)
    assert sum(in_splits) == c1 and (len(in_splits) == 1 or k == 1)
    if len(in_splits) == 1:
        w_parts = (w2,)
    else:
        w_parts, off = [], 0
        for csz in in_splits:
            w_parts.append(w2[off:off + csz])
            off += csz
        w_parts = tuple(w_parts)
    return {"w_parts": w_parts,
            "scale": jnp.pad(scale, (0, n_pad - c2)).reshape(1, n_pad),
            "bias": jnp.pad(bias, (0, n_pad - c2)).reshape(1, n_pad),
            "k": k, "s": s, "c2": c2}


IDS = (-1, -3, -5, -6)


def _make_mcb(key, c1, c2, c3, n=4, ids=IDS, in_splits=None):
    keys = jax.random.split(key, n + 2)
    return {
        # cv1 and cv2 share the same input -> fused along output channels.
        "cv12": _fold_conv(keys[0], c1, 2 * c2, 1, 1, in_splits=in_splits),
        "cv3": [_fold_conv(keys[1 + i], c2, c2, 3, 1) for i in range(n)],
        "cv4": _fold_conv(keys[n + 1], c2 * len(ids), c3, 1, 1,
                          in_splits=(c2,) * len(ids)),
        "ids": ids,
        "c2": c2,
    }


def mcb_forward(parts, p):
    f = conv1x1_multi(parts, p["cv12"])          # cv1 || cv2 in one matmul
    c2 = p["c2"]
    x1, x2 = f[..., :c2], f[..., c2:]
    xall = [x1, x2]
    for cv in p["cv3"]:
        x2 = conv_bn_silu(x2, cv)
        xall.append(x2)
    sel = [xall[i] for i in p["ids"]]
    return conv1x1_multi(sel, p["cv4"])          # concat folded into the kernel


def _make_tb(key, c1, c2):
    k1, k2, k3 = jax.random.split(key, 3)
    return {"cv1": _fold_conv(k1, c1, c2, 1),
            "cv2": _fold_conv(k2, c1, c2, 1),
            "cv3": _fold_conv(k3, c2, c2, 3, 2)}


def tb_forward(x, p):
    x1 = conv1x1_multi([maxpool2x2(x)], p["cv1"])
    x2 = conv_bn_silu(conv1x1_multi([x], p["cv2"]), p["cv3"])
    return [x2, x1]        # torch.cat([x_2, x_1], 1) kept as parts (no copy)


def make_params(key):
    tc, bc, n = 32, 32, 4            # transition_channels, block_channels, n
    ks = jax.random.split(key, 11)
    return {
        "stem": [_fold_conv(ks[0], 3, tc, 3, 1),
                 _fold_conv(ks[1], tc, tc * 2, 3, 2),
                 _fold_conv(ks[2], tc * 2, tc * 2, 3, 1)],
        "dark2": {"conv": _fold_conv(ks[3], tc * 2, tc * 4, 3, 2),
                  "mcb": _make_mcb(ks[4], tc * 4, bc * 2, tc * 8, n,
                                   in_splits=(tc * 4,))},
        "dark3": {"tb": _make_tb(ks[5], tc * 8, tc * 4),
                  "mcb": _make_mcb(ks[6], tc * 8, bc * 4, tc * 16, n,
                                   in_splits=(tc * 4, tc * 4))},
        "dark4": {"tb": _make_tb(ks[7], tc * 16, tc * 8),
                  "mcb": _make_mcb(ks[8], tc * 16, bc * 8, tc * 32, n,
                                   in_splits=(tc * 8, tc * 8))},
        "dark5": {"tb": _make_tb(ks[9], tc * 32, tc * 16),
                  "mcb": _make_mcb(ks[10], tc * 32, bc * 8, tc * 32, n,
                                   in_splits=(tc * 16, tc * 16))},
    }


def eelan_yolov7_forward(x_nchw, params):
    x = jnp.transpose(x_nchw, (0, 2, 3, 1)).astype(jnp.bfloat16)   # NCHW -> NHWC
    for p in params["stem"]:
        x = conv_bn_silu(x, p)
    x = conv_bn_silu(x, params["dark2"]["conv"])
    x = mcb_forward([x], params["dark2"]["mcb"])
    p3 = mcb_forward(tb_forward(x, params["dark3"]["tb"]), params["dark3"]["mcb"])
    p4 = mcb_forward(tb_forward(p3, params["dark4"]["tb"]), params["dark4"]["mcb"])
    p5 = mcb_forward(tb_forward(p4, params["dark5"]["tb"]), params["dark5"]["mcb"])
    to_nchw = lambda t: jnp.transpose(t, (0, 3, 1, 2)).astype(jnp.float32)
    return to_nchw(p3), to_nchw(p4), to_nchw(p5)


# ----------------------------------------------------------------------------
# lightweight correctness self-check against plain-XLA references
# ----------------------------------------------------------------------------
def _conv_reference(x, p):
    k, s, c2 = p["k"], p["s"], p["c2"]
    w_full = jnp.concatenate(p["w_parts"], axis=0).astype(jnp.float32)
    cin = w_full.shape[0] // (k * k)
    w4 = w_full[:, :c2].reshape(k, k, cin, c2)
    y = jax.lax.conv_general_dilated(
        x.astype(jnp.float32), w4, window_strides=(s, s),
        padding=[(k // 2, k // 2)] * 2,
        dimension_numbers=("NHWC", "HWIO", "NHWC"))
    y = y * p["scale"][0, :c2] + p["bias"][0, :c2]
    return y * jax.nn.sigmoid(y)


def _self_check():
    key = jax.random.PRNGKey(123)
    kx, k1, k2 = jax.random.split(key, 3)
    x = jax.random.normal(kx, (2, 16, 16, 64), jnp.float32).astype(jnp.bfloat16)

    for stride in (1, 2):                               # 3x3 im2col path
        p = _fold_conv(k1, 64, 96, 3, stride)
        got = conv_bn_silu(x, p).astype(jnp.float32)
        want = _conv_reference(x, p)
        err = float(jnp.max(jnp.abs(got - want)))
        ref = float(jnp.max(jnp.abs(want))) + 1e-3
        assert err <= 0.03 * ref + 0.03, f"conv3x3 s{stride} mismatch: {err}"

    p = _fold_conv(k2, 64, 160, 1, 1, in_splits=(32, 32))   # multi-part 1x1
    got = conv1x1_multi([x[..., :32], x[..., 32:]], p).astype(jnp.float32)
    want = _conv_reference(x, p)
    err = float(jnp.max(jnp.abs(got - want)))
    ref = float(jnp.max(jnp.abs(want))) + 1e-3
    assert err <= 0.03 * ref + 0.03, f"conv1x1 multi-part mismatch: {err}"

    got = maxpool2x2(x)                                  # 2x2/s2 max-pool
    want = jnp.maximum(jnp.maximum(x[:, 0::2, 0::2], x[:, 0::2, 1::2]),
                       jnp.maximum(x[:, 1::2, 0::2], x[:, 1::2, 1::2]))
    assert bool(jnp.all(got == want)), "maxpool mismatch"


if __name__ == "__main__":
    _self_check()
    key = jax.random.PRNGKey(0)
    pkey, xkey = jax.random.split(key)
    params = make_params(pkey)
    # small input consistent with the module: 3 channels, /32-divisible spatial
    x = jax.random.normal(xkey, (1, 3, 64, 64), jnp.float32)
    fwd = jax.jit(functools.partial(eelan_yolov7_forward, params=params))
    p3, p4, p5 = fwd(x)
    jax.block_until_ready((p3, p4, p5))
    assert p3.shape == (1, 512, 8, 8), p3.shape
    assert p4.shape == (1, 1024, 4, 4), p4.shape
    assert p5.shape == (1, 1024, 2, 2), p5.shape
    print("KERNEL_OK")
</pallas_src>

<mosaic_0001>
module attributes {stable_mosaic.version = 11 : i64} {
  func.func @kernel(%arg0: i32, %arg1: i32, %arg2: memref<256x576xbf16, #tpu.memory_space<vmem>>, %arg3: memref<576x128xbf16, #tpu.memory_space<vmem>>, %arg4: memref<1x128xf32, #tpu.memory_space<vmem>>, %arg5: memref<1x128xf32, #tpu.memory_space<vmem>>, %arg6: memref<256x128xbf16, #tpu.memory_space<vmem>>) attributes {dimension_semantics = [#tpu.dimension_semantics<parallel>, #tpu.dimension_semantics<parallel>], iteration_bounds = array<i64: 2, 1>, scalar_prefetch = 0 : i64, scratch_operands = 0 : i64, tpu.core_type = #tpu.core_type<tc>, window_params = [{transform_indices = @transform_0, window_bounds = array<i64: 256, 576>}, {transform_indices = @transform_1, window_bounds = array<i64: 576, 128>}, {transform_indices = @transform_2, window_bounds = array<i64: 1, 128>}, {transform_indices = @transform_3, window_bounds = array<i64: 1, 128>}, {transform_indices = @transform_4, window_bounds = array<i64: 256, 128>}]} {
    %c0 = arith.constant 0 : index
    %c0_0 = arith.constant 0 : index
    %0 = vector.load %arg2[%c0, %c0_0] : memref<256x576xbf16, #tpu.memory_space<vmem>>, vector<256x576xbf16>
    %c0_1 = arith.constant 0 : index
    %c0_2 = arith.constant 0 : index
    %1 = vector.load %arg3[%c0_1, %c0_2] : memref<576x128xbf16, #tpu.memory_space<vmem>>, vector<576x128xbf16>
    %cst = arith.constant dense<0.000000e+00> : vector<256x128xf32>
    %2 = tpu.matmul %0, %1, %cst {dimension_numbers = #tpu.dot_dimension_numbers<[1], [0], [0], [1], [0, 0, 1, 1], [], []>} : vector<256x576xbf16>, vector<576x128xbf16>, vector<256x128xf32> -> vector<256x128xf32>
    %c0_3 = arith.constant 0 : index
    %c0_4 = arith.constant 0 : index
    %3 = vector.load %arg4[%c0_3, %c0_4] : memref<1x128xf32, #tpu.memory_space<vmem>>, vector<1x128xf32>
    %4 = vector.broadcast %3 : vector<1x128xf32> to vector<256x128xf32>
    %5 = arith.mulf %2, %4 : vector<256x128xf32>
    %c0_5 = arith.constant 0 : index
    %c0_6 = arith.constant 0 : index
    %6 = vector.load %arg5[%c0_5, %c0_6] : memref<1x128xf32, #tpu.memory_space<vmem>>, vector<1x128xf32>
    %7 = vector.broadcast %6 : vector<1x128xf32> to vector<256x128xf32>
    %8 = arith.addf %5, %7 : vector<256x128xf32>
    %cst_7 = arith.constant 0.000000e+00 : f32
    %9 = vector.broadcast %cst_7 : f32 to vector<256x128xf32>
    %10 = arith.subf %9, %8 : vector<256x128xf32>
    %11 = math.exp %10 : vector<256x128xf32>
    %cst_8 = arith.constant 1.000000e+00 : f32
    %12 = vector.broadcast %cst_8 : f32 to vector<256x128xf32>
    %13 = arith.addf %12, %11 : vector<256x128xf32>
    %14 = tpu.reciprocal %13 {approx = true} : vector<256x128xf32> -> vector<256x128xf32>
    %15 = arith.mulf %8, %14 : vector<256x128xf32>
    %16 = arith.truncf %15 : vector<256x128xf32> to vector<256x128xbf16>
    %c0_9 = arith.constant 0 : index
    %c0_10 = arith.constant 0 : index
    %17 = vector.load %arg6[%c0_9, %c0_10] : memref<256x128xbf16, #tpu.memory_space<vmem>>, vector<256x128xbf16>
    tpu.vector_store %arg6[%c0_9, %c0_10], %16 {strides = array<i32>} : memref<256x128xbf16, #tpu.memory_space<vmem>>, vector<256x128xbf16>,
    return
  }
  func.func @transform_0(%arg0: i32, %arg1: i32) -> (i32, i32) {
    %c0_i32 = arith.constant 0 : i32
    %c0_i32_0 = arith.constant 0 : i32
    return %arg0, %c0_i32 : i32, i32
  }
  func.func @transform_1(%arg0: i32, %arg1: i32) -> (i32, i32) {
    %c0_i32 = arith.constant 0 : i32
    %c0_i32_0 = arith.constant 0 : i32
    return %c0_i32, %arg1 : i32, i32
  }
  func.func @transform_2(%arg0: i32, %arg1: i32) -> (i32, i32) {
    %c0_i32 = arith.constant 0 : i32
    %c0_i32_0 = arith.constant 0 : i32
    return %c0_i32, %arg1 : i32, i32
  }
  func.func @transform_3(%arg0: i32, %arg1: i32) -> (i32, i32) {
    %c0_i32 = arith.constant 0 : i32
    %c0_i32_0 = arith.constant 0 : i32
    return %c0_i32, %arg1 : i32, i32
  }
  func.func @transform_4(%arg0: i32, %arg1: i32) -> (i32, i32) {
    %c0_i32 = arith.constant 0 : i32
    return %arg0, %arg1 : i32, i32
  }
}

</mosaic_0001>

<bundles_post_ra>
// kernel: tpu_custom_call.1
= control target key start
LH: loop header
LB: loop body
LE: loop exit
PB: predicated region body
PF: predicated region fallthrough
CT: control target
= control target key end

     0   :  { %9 = vsyncpa [#allocation3], 0  ;;  %s3896_s0 = inlined_call_operand.vmem [shape: bf16[512,576], index: 0, kind: input, shape index: {}]   ;;  %s3897_s1 = inlined_call_operand.vmem [shape: bf16[576,128], index: 1, kind: input, shape index: {}]   ;;  %s3898_s2 = inlined_call_operand.vmem [shape: f32[1,128], index: 2, kind: input, shape index: {}]   ;;  %s3899_s3 = inlined_call_operand.vmem [shape: f32[1,128], index: 3, kind: input, shape index: {}]   ;;  %s3900_s4 = inlined_call_operand.hbm [shape: bf16[512,128], index: 4, kind: output, shape index: {}]  }
   0x1   :  { %11 = vsyncpa [#allocation3 + $0x1], 0  ;;  %s3186_s15 = smov 0   ;;  %s3188_s16 = smov 0  }
   0x2   :  { %s3190_s17 = smov 0   ;;  %s3192_s18 = smov 0  }
   0x3   :  { %s3194_s19 = smov 0   ;;  %s3196_s20 = smov 0  }
   0x4 LB: > { %s2134_s21 = sadd.s32 4294967295, %s3156_s20   ;;  %s2135_s22 = sadd.s32 4294967294, %s3156_s20   ;;  %s3156_s20 = sphi %s3196_s20, %s17_s20   ;;  %s3152_s19 = sphi %s3194_s19, %s3907_s19   ;;  %s3148_s18 = sphi %s3192_s18, %s3906_s18   ;;  %s3144_s17 = sphi %s3190_s17, %s3905_s17   ;;  %s3140_s16 = sphi %s3188_s16, %s3904_s16   ;;  %s3136_s15 = sphi %s3186_s15, %s3903_s15  }
   0x5   : > { %s29_s23 = sadd.s32 1, %s3152_s19  ;;  %s142_s24 = sadd.s32 1, %s3144_s17 }
   0x6   : > { %p31_p0 = scmp.ge.s32.totalorder %s29_s23, 2  ;;  %p152_p1 = scmp.ne.s32.totalorder %s3144_s17, %s3140_s16 }
   0x7   : > { %p153_p2 = scmp.eq.s32.totalorder %s2134_s21, 1  ;;  %p158_p3 = scmp.ne.s32.totalorder %s3140_s16, %s3136_s15 }
   0x8   : > { %s3909_s23 = smov (%p31_p0, %s29_s23), 0  ;;  %p159_p5 = scmp.eq.s32.totalorder %s2135_s22, 1 }
   0x9   : > { %p3226_p4 = por %p153_p2, %p152_p1  ;;  %s137_s26 = ssub.s32 %s3152_s19, %s3909_s23 }
   0xa   : > { %p2141_p6 = scmp.ge.s32.totalorder %s3156_s20, 1  ;;  %p140_p7 = scmp.eq.s32.totalorder %s137_s26, 0 }
   0xb   : > { %p3233_p8 = por %p159_p5, %p158_p3  ;;  %p206_p9 = scmp.lt.s32.totalorder %s3156_s20, 3 }
   0xc   : > { %s3239_s28 = scalar_select %p140_p7, %s3144_s17, %s142_s24  }
   0xd   : > { %p207_p10 = pnand %p2141_p6, %p206_p9 }
   0xe   : > { %v2802_v0 = vld [vmem:[%s3897_s1 + $0x40] sm:$0xff] (!%p207_p10)   ;;  %s2143_s5 = sshll.u32 (!%p207_p10), %s3148_s18, 5  ;;  %v2804_v2 = vld [vmem:[%s3897_s1 + $0x48] sm:$0xff] (!%p207_p10)   ;;  %v2806_v4 = vld [vmem:[%s3897_s1 + $0x50] sm:$0xff] (!%p207_p10)   ;;  %vm1046_vm0 = vcmask (!%p207_p10), 523264   ;;  %s240_s7 = sand.u32 (!%p207_p10), 1, %s3140_s16  }
   0xf   : > { %210 = sbr.rel (%p207_p10) target bundleno = 483 (0x1e3), region = 36  ;;  %v2803_v1 = vld [vmem:[%s3897_s1] sm:$0xff] (!%p207_p10)   ;;  %2444 = vmatprep.subr.bf16.mxu0 (!%p207_p10), %v2802_v0  ;;  %2728 = vmatprep.subr.bf16.mxu1 (!%p207_p10), %v2802_v0  ;;  %p244_p11 = scmp.lt.s32.totalorder (!%p207_p10), %s2143_s5, 63  ;;  %v2805_v3 = vld [vmem:[%s3897_s1 + $0x8] sm:$0xff] (!%p207_p10)   ;;  %v2807_v5 = vld [vmem:[%s3897_s1 + $0x10] sm:$0xff] (!%p207_p10)  }
  0x10   : > { %2445 = vmatpush3.bf16.msra.mxu0 (!%p207_p10), %v2803_v1  ;;  %2736 = vmatpush3.bf16.msra.mxu1 (!%p207_p10), %v2803_v1  ;;  %v2808_v6 = vld [vmem:[%s3897_s1 + $0x58] sm:$0xff] (!%p207_p10)   ;;  %v2810_v8 = vld [vmem:[%s3897_s1 + $0x60] sm:$0xff] (!%p207_p10)   ;;  %v2812_v10 = vld [vmem:[%s3897_s1 + $0x68] sm:$0xff] (!%p207_p10)   ;;  %s3643_s8 = sshll.u32 (!%p207_p10), %s240_s7, 7  ;;  %s3158_s22 = smov (!%p207_p10), [#allocation2]  }
  0x11   : > { %2446 = vmatprep.subr.bf16.mxu0 (!%p207_p10), %v2804_v2  ;;  %2729 = vmatprep.subr.bf16.mxu1 (!%p207_p10), %v2804_v2  ;;  %v2809_v7 = vld [vmem:[%s3897_s1 + $0x18] sm:$0xff] (!%p207_p10)   ;;  %v2811_v9 = vld [vmem:[%s3897_s1 + $0x20] sm:$0xff] (!%p207_p10)   ;;  %v2813_v13 = vld [vmem:[%s3897_s1 + $0x28] sm:$0xff] (!%p207_p10)   ;;  %s3663_s9 = scalar_lea.vmem (!%p207_p10), [#allocation2], %s3643_s8  ;;  %s3082_s24 = sshll.u32 (!%p207_p10), %s3158_s22, 4  ;;  %s3083_s24 = int_to_ptr.vmem [resolvable:$false] %s3082_s24 }
  0x12   : > { %v2814_v14 = vld [vmem:[%s3897_s1 + $0x70] sm:$0xff] (!%p207_p10)   ;;  %v2816_v16 = vld [vmem:[%s3897_s1 + $0x78] sm:$0xff] (!%p207_p10)   ;;  %v2824_v18 = vld [vmem:[%s3897_s1 + $0xc0] sm:$0xff] (!%p207_p10)   ;;  %s2023_s11 = sshll.u32 (!%p207_p10), %s3663_s9, 4  ;;  %s3844_s11 = int_to_ptr.vmem [resolvable:$true] %s2023_s11 }
  0x13   : > { %v2815_v15 = vld [vmem:[%s3897_s1 + $0x30] sm:$0xff] (!%p207_p10)   ;;  %v2817_v17 = vld [vmem:[%s3897_s1 + $0x38] sm:$0xff] (!%p207_p10)   ;;  %v2827_v19 = vld [vmem:[%s3897_s1 + $0x100] sm:$0xff] (!%p207_p10)   ;;  %s3078_s21 = scalar_lea.vmem (!%p207_p10), %s3844_s11, 2048  ;;  %p3085_p1 = scmp.lt.s32.totalorder (!%p207_p10), %s3844_s11, %s3083_s24 }
  0x14   : > { %2447 = vmatpush3.bf16.msra.mxu0 (!%p207_p10), %v2805_v3  ;;  %2737 = vmatpush3.bf16.msra.mxu1 (!%p207_p10), %v2805_v3  ;;  %v2825_v22 = vld [vmem:[%s3897_s1 + $0x80] sm:$0xff] (!%p207_p10)   ;;  %v2826_v23 = vld [vmem:[%s3897_s1 + $0xc8] sm:$0xff] (!%p207_p10)   ;;  %v2835_v28 = vld [vmem:[%s3897_s1 + $0xd0] sm:$0xff] (!%p207_p10)   ;;  %p3079_p12 = scmp.ne.s32.totalorder (!%p207_p10), %s3844_s11, %s3078_s21 }
  0x15   : > { %2448 = vmatprep.subr.bf16.mxu0 (!%p207_p10), %v2806_v4  ;;  %2730 = vmatprep.subr.bf16.mxu1 (!%p207_p10), %v2806_v4  ;;  %v2828_v26 = vld [vmem:[%s3897_s1 + $0x88] sm:$0xff] (!%p207_p10)   ;;  %v2836_v30 = vld [vmem:[%s3897_s1 + $0x90] sm:$0xff] (!%p207_p10)   ;;  %v2837_v31 = vld [vmem:[%s3897_s1 + $0xd8] sm:$0xff] (!%p207_p10)  }
  0x16   : > { %s3911_s5 = smov (!%p244_p11, %s2143_s5), 63  ;;  %v2838_v34 = vld [vmem:[%s3897_s1 + $0x98] sm:$0xff]   ;;  %v2858_v35 = vld [vmem:[%s3897_s1 + $0x108] sm:$0xff]   ;;  %v2845_v37 = vld [vmem:[%s3897_s1 + $0xe0] sm:$0xff]   ;;  %p3080_p13 = pnand %p3079_p12, %p3226_p4 }
  0x17   : > { %s2744_s26 = smul.u32 20, %s3911_s5  ;;  %v2846_v39 = vld [vmem:[%s3897_s1 + $0xa0] sm:$0xff]   ;;  %v2847_v40 = vld [vmem:[%s3897_s1 + $0xe8] sm:$0xff]   ;;  %v2855_v46 = vld [vmem:[%s3897_s1 + $0xf0] sm:$0xff]   ;;  %s2348_s5 = sshll.u32 %s3148_s18, 11 }
  0x18   : > { %2449 = vmatpush3.bf16.msra.mxu0 %v2807_v5  ;;  %2738 = vmatpush3.bf16.msra.mxu1 %v2807_v5  ;;  %v2848_v43 = vld [vmem:[%s3897_s1 + $0xa8] sm:$0xff]   ;;  %v2878_v47 = vld [vmem:[%s3897_s1 + $0x110] sm:$0xff]   ;;  %v2857_v49 = vld [vmem:[%s3897_s1 + $0xf8] sm:$0xff]   ;;  %s3842_s14 = scalar_lea.hbm %s3900_s4, %s2348_s5  ;;  %s3850_s18 = scalar_lea.sflag [#allocation3], %s240_s7 }
  0x19   : > { %2450 = vmatprep.subr.bf16.mxu0 %v2808_v6  ;;  %2731 = vmatprep.subr.bf16.mxu1 %v2808_v6  ;;  %s3272_s10 = scalar_lea.vmem %s3896_s0, %s2744_s26  ;;  %v2856_v48 = vld [vmem:[%s3897_s1 + $0xb0] sm:$0xff]   ;;  %v2859_v52 = vld [vmem:[%s3897_s1 + $0xb8] sm:$0xff]   ;;  %p3081_p0 = pneg %p3080_p13 }
  0x1a   : > { %v2820_v11 = vld [vmem:[%s3272_s10 + $0x4] ss:$20 sps:$4 sm:$0xff]   ;;  %v2818_v20 = vld [vmem:[%s3272_s10] ss:$20 sps:$4 sm:$0xff]   ;;  %v2833_v27 = vld [vmem:[%s3272_s10 + $0x28] ss:$20 sps:$4 sm:$0xff]  }
  0x1b   : > { %v2823_v12 = vld [vmem:[%s3272_s10 + $0x1e4] ss:$20 sps:$4 sm:$0xff]   ;;  %1127 = vmatprep.mubr.bf16.mxu0 %v2820_v11  ;;  %v2821_v21 = vld [vmem:[%s3272_s10 + $0x1e0] ss:$20 sps:$4 sm:$0xff]   ;;  %v2834_v29 = vld [vmem:[%s3272_s10 + $0x208] ss:$20 sps:$4 sm:$0xff]  }
  0x1c   : > { %2451 = vmatpush3.bf16.msra.mxu0 %v2809_v7  ;;  %2739 = vmatpush3.bf16.msra.mxu1 %v2809_v7  ;;  %v2829_v24 = vld [vmem:[%s3272_s10 + $0x2c] ss:$20 sps:$4 sm:$0xff]   ;;  %v2839_v32 = vld [vmem:[%s3272_s10 + $0x54] ss:$20 sps:$4 sm:$0xff]   ;;  %v2843_v36 = vld [vmem:[%s3272_s10 + $0x50] ss:$20 sps:$4 sm:$0xff]  }
  0x1d   : > { %2452 = vmatprep.subr.bf16.mxu0 %v2810_v8  ;;  %2732 = vmatprep.subr.bf16.mxu1 %v2810_v8  ;;  %v2831_v25 = vld [vmem:[%s3272_s10 + $0x20c] ss:$20 sps:$4 sm:$0xff]   ;;  %v2841_v33 = vld [vmem:[%s3272_s10 + $0x234] ss:$20 sps:$4 sm:$0xff]   ;;  %v2844_v38 = vld [vmem:[%s3272_s10 + $0x230] ss:$20 sps:$4 sm:$0xff]  }
  0x1e   : > { %1223 = vmatprep.mubr.bf16.mxu1 %v2823_v12  ;;  %v2849_v41 = vld [vmem:[%s3272_s10 + $0x7c] ss:$20 sps:$4 sm:$0xff]   ;;  %v2853_v44 = vld [vmem:[%s3272_s10 + $0x78] ss:$20 sps:$4 sm:$0xff]   ;;  %v2865_v54 = vld [vmem:[%s3272_s10 + $0xa0] ss:$20 sps:$4 sm:$0xff]  }
  0x1f   : > { %v2851_v42 = vld [vmem:[%s3272_s10 + $0x25c] ss:$20 sps:$4 sm:$0xff]   ;;  %v2854_v45 = vld [vmem:[%s3272_s10 + $0x258] ss:$20 sps:$4 sm:$0xff]   ;;  %v2868_v57 = vld [vmem:[%s3272_s10 + $0x34] ss:$20 sps:$4 sm:$0xff]  }
  0x20   : > { %2453 = vmatpush3.bf16.msra.mxu0 %v2811_v9  ;;  %2740 = vmatpush3.bf16.msra.mxu1 %v2811_v9  ;;  %v2860_v50 = vld [vmem:[%s3272_s10 + $0xa4] ss:$20 sps:$4 sm:$0xff]   ;;  %v2864_v51 = vld [vmem:[%s3272_s10 + $0xc] ss:$20 sps:$4 sm:$0xff]   ;;  %v2862_v53 = vld [vmem:[%s3272_s10 + $0x8] ss:$20 sps:$4 sm:$0xff]  }
  0x21   : > { %2454 = vmatprep.subr.bf16.mxu0 %v2812_v10  ;;  %2733 = vmatprep.subr.bf16.mxu1 %v2812_v10  ;;  %v2866_v55 = vld [vmem:[%s3272_s10 + $0xcc] ss:$20 sps:$4 sm:$0xff]   ;;  %v2897_v56 = vld [vmem:[%s3897_s1 + $0x118] sm:$0xff]   ;;  %v2871_v59 = vld [vmem:[%s3272_s10 + $0x30] ss:$20 sps:$4 sm:$0xff]   ;;  %s3084_s26 = scalar_lea.vmem %s3083_s24, 4096 }
  0x22   : > { %v2870_v58 = vld [vmem:[%s3272_s10 + $0xc8] ss:$20 sps:$4 sm:$0xff]   ;;  %v2876_v62 = vld [vmem:[%s3272_s10 + $0xf0] ss:$20 sps:$4 sm:$0xff]   ;;  %v2877_v63 = vld [vmem:[%s3272_s10 + $0x58] ss:$20 sps:$4 sm:$0xff]   ;;  %p3086_p2 = scmp.lt.s32.totalorder %s3084_s26, %s3078_s21 }
  0x23   : > { %v2872_v60 = vld [vmem:[%s3272_s10 + $0xf4] ss:$20 sps:$4 sm:$0xff]   ;;  %v2874_v61 = vld [vmem:[%s3272_s10 + $0x5c] ss:$20 sps:$4 sm:$0xff]   ;;  %v2881_v1 = vld [vmem:[%s3272_s10 + $0x84] ss:$20 sps:$4 sm:$0xff]  }
  0x24   : > { %2455 = vmatpush3.bf16.msra.mxu0 %v2813_v13  ;;  %2741 = vmatpush3.bf16.msra.mxu1 %v2813_v13  ;;  %v2879_v0 = vld [vmem:[%s3272_s10 + $0x11c] ss:$20 sps:$4 sm:$0xff]   ;;  %v2883_v2 = vld [vmem:[%s3272_s10 + $0x118] ss:$20 sps:$4 sm:$0xff]   ;;  %v2884_v3 = vld [vmem:[%s3272_s10 + $0x80] ss:$20 sps:$4 sm:$0xff]   ;;  %p3087_p3 = por %p3086_p2, %p3085_p1 }
  0x25   : > { %2456 = vmatprep.subr.bf16.mxu0 %v2814_v14  ;;  %2734 = vmatprep.subr.bf16.mxu1 %v2814_v14  ;;  %v2885_v4 = vld [vmem:[%s3272_s10 + $0x144] ss:$20 sps:$4 sm:$0xff]   ;;  %v2887_v5 = vld [vmem:[%s3272_s10 + $0xac] ss:$20 sps:$4 sm:$0xff]   ;;  %v2890_v7 = vld [vmem:[%s3272_s10 + $0xa8] ss:$20 sps:$4 sm:$0xff]  }
  0x26   : > { %v2889_v6 = vld [vmem:[%s3272_s10 + $0x140] ss:$20 sps:$4 sm:$0xff]   ;;  %v2895_v10 = vld [vmem:[%s3272_s10 + $0x168] ss:$20 sps:$4 sm:$0xff]   ;;  %v2896_v11 = vld [vmem:[%s3272_s10 + $0xd0] ss:$20 sps:$4 sm:$0xff]   ;;  %p3088_p5 = pnand %p3087_p3, %p3081_p0 }
  0x27   : > { %v2891_v8 = vld [vmem:[%s3272_s10 + $0x16c] ss:$20 sps:$4 sm:$0xff]   ;;  %v2893_v9 = vld [vmem:[%s3272_s10 + $0xd4] ss:$20 sps:$4 sm:$0xff]   ;;  %v2900_v13 = vld [vmem:[%s3272_s10 + $0xfc] ss:$20 sps:$4 sm:$0xff]  }
  0x28   : > { %2457 = vmatpush3.bf16.msra.mxu0 %v2815_v15  ;;  %2742 = vmatpush3.bf16.msra.mxu1 %v2815_v15  ;;  %v2898_v12 = vld [vmem:[%s3272_s10 + $0x194] ss:$20 sps:$4 sm:$0xff]   ;;  %v2902_v14 = vld [vmem:[%s3272_s10 + $0x190] ss:$20 sps:$4 sm:$0xff]   ;;  %v2903_v15 = vld [vmem:[%s3272_s10 + $0xf8] ss:$20 sps:$4 sm:$0xff]  }
  0x29   : > { %2458 = vmatprep.subr.bf16.mxu0 %v2816_v16  ;;  %2735 = vmatprep.subr.bf16.mxu1 %v2816_v16  ;;  %v2904_v16 = vld [vmem:[%s3272_s10 + $0x1bc] ss:$20 sps:$4 sm:$0xff]  }
  0x2c   : > { %2459 = vmatpush3.bf16.msra.mxu0 %v2817_v17  ;;  %2743 = vmatpush3.bf16.msra.mxu1 %v2817_v17  ;;  %v2906_v17 = vld [vmem:[%s3272_s10 + $0x124] ss:$20 sps:$4 sm:$0xff]  }
  0x2d   : > { %2556 = vmatprep.subr.bf16.mxu1 %v2824_v18  ;;  %2688 = vmatprep.subr.bf16.mxu0 %v2827_v19  ;;  %v2908_v18 = vld [vmem:[%s3272_s10 + $0x1b8] ss:$20 sps:$4 sm:$0xff]  }
  0x2f   : > { %1128 = vmatmul.mubr.bf16.vlgmr.msra.gmra.mrb[0].mxu0 %v2818_v20  ;;  %1224 = vmatmul.mubr.bf16.vlgmr.msra.gmra.mrb[0].mxu1 %v2821_v21  ;;  %v2910_v20 = vld [vmem:[%s3272_s10 + $0x14c] ss:$20 sps:$4 sm:$0xff]   ;;  %v2912_v21 = vld [vmem:[%s3272_s10 + $0x10] ss:$20 sps:$4 sm:$0xff]  }
  0x30   : > { %2557 = vmatpush3.bf16.msra.mxu1 %v2825_v22  ;;  %2689 = vmatpush3.bf16.msra.mxu0 %v2827_v19  ;;  %v2909_v19 = vld [vmem:[%s3272_s10 + $0x120] ss:$20 sps:$4 sm:$0xff]   ;;  %v2913_v22 = vld [vmem:[%s3272_s10 + $0x148] ss:$20 sps:$4 sm:$0xff]  }
  0x31   : > { %2558 = vmatprep.subr.bf16.mxu1 %v2826_v23  ;;  %1135 = vmatprep.mubr.bf16.mxu0 %v2829_v24  ;;  %v2914_v23 = vld [vmem:[%s3272_s10 + $0x38] ss:$20 sps:$4 sm:$0xff]   ;;  %v2915_v24 = vld [vmem:[%s3272_s10 + $0x174] ss:$20 sps:$4 sm:$0xff]  }
  0x32   : > { %1231 = vmatprep.mubr.bf16.mxu1 %v2831_v25  ;;  %2690 = vmatprep.subr.bf16.mxu0 %v2858_v35  ;;  %v2917_v25 = vld [vmem:[%s3272_s10 + $0x60] ss:$20 sps:$4 sm:$0xff]  }
  0x34   : > { %2559 = vmatpush3.bf16.msra.mxu1 %v2828_v26  ;;  %2691 = vmatpush3.bf16.msra.mxu0 %v2858_v35  ;;  %v2918_v26 = vld [vmem:[%s3272_s10 + $0x170] ss:$20 sps:$4 sm:$0xff]   ;;  %v2929_v35 = vld [vmem:[%s3272_s10 + $0x128] ss:$20 sps:$4 sm:$0xff]  }
  0x35   : > { %2560 = vmatprep.subr.bf16.mxu1 %v2835_v28  ;;  %2692 = vmatprep.subr.bf16.mxu0 %v2878_v47  ;;  %v2920_v28 = vld [vmem:[%s3272_s10 + $0x19c] ss:$20 sps:$4 sm:$0xff]  }
  0x37   : > { %1136 = vmatmul.mubr.bf16.gmra.mrb[4].mxu0 %v2833_v27  ;;  %1232 = vmatmul.mubr.bf16.gmra.mrb[4].mxu1 %v2834_v29  ;;  %v2919_v27 = vld [vmem:[%s3272_s10 + $0x88] ss:$20 sps:$4 sm:$0xff]   ;;  %v2922_v29 = vld [vmem:[%s3272_s10 + $0xb0] ss:$20 sps:$4 sm:$0xff]  }
  0x38   : > { %2561 = vmatpush3.bf16.msra.mxu1 %v2836_v30  ;;  %1143 = vmatprep.mubr.bf16.mxu0 %v2839_v32  ;;  %v2923_v30 = vld [vmem:[%s3272_s10 + $0x198] ss:$20 sps:$4 sm:$0xff]  }
  0x39   : > { %2562 = vmatprep.subr.bf16.mxu1 %v2837_v31  ;;  %1239 = vmatprep.mubr.bf16.mxu1 %v2841_v33  ;;  %v2924_v31 = vld [vmem:[%s3272_s10 + $0xd8] ss:$20 sps:$4 sm:$0xff]   ;;  %v2927_v33 = vld [vmem:[%s3272_s10 + $0x100] ss:$20 sps:$4 sm:$0xff]  }
  0x3a   : > { %2693 = vmatpush3.bf16.msra.mxu0 %v2878_v47  ;;  %v2925_v32 = vld [vmem:[%s3272_s10 + $0x1c4] ss:$20 sps:$4 sm:$0xff]  }
  0x3b   : > { %2694 = vmatprep.subr.bf16.mxu0 %v2897_v56  ;;  %v2944_v47 = vld [vmem:[%s3272_s10 + $0x218] ss:$20 sps:$4 sm:$0xff]  }
  0x3c   : > { %2563 = vmatpush3.bf16.msra.mxu1 %v2838_v34  ;;  %v2928_v34 = vld [vmem:[%s3272_s10 + $0x1c0] ss:$20 sps:$4 sm:$0xff]  }
  0x3d   : > { %2564 = vmatprep.subr.bf16.mxu1 %v2845_v37  ;;  %v2932_v37 = vld [vmem:[%s3272_s10 + $0x150] ss:$20 sps:$4 sm:$0xff]  }
  0x3e   : > { %2695 = vmatpush3.bf16.msra.mxu0 %v2897_v56 }
  0x3f   : > { %1144 = vmatmul.mubr.bf16.gmra.mrb[8].mxu0 %v2843_v36  ;;  %1240 = vmatmul.mubr.bf16.gmra.mrb[8].mxu1 %v2844_v38  ;;  %v2930_v36 = vld [vmem:[%s3272_s10 + $0x1ec] ss:$20 sps:$4 sm:$0xff]   ;;  %v2933_v38 = vld [vmem:[%s3272_s10 + $0x1e8] ss:$20 sps:$4 sm:$0xff]  }
  0x40   : > { %2565 = vmatpush3.bf16.msra.mxu1 %v2846_v39  ;;  %1151 = vmatprep.mubr.bf16.mxu0 %v2849_v41  ;;  %v2934_v39 = vld [vmem:[%s3272_s10 + $0x178] ss:$20 sps:$4 sm:$0xff]   ;;  %v2937_v41 = vld [vmem:[%s3272_s10 + $0x1a0] ss:$20 sps:$4 sm:$0xff]  }
  0x41   : > { %2566 = vmatprep.subr.bf16.mxu1 %v2847_v40  ;;  %1247 = vmatprep.mubr.bf16.mxu1 %v2851_v42  ;;  %v2935_v40 = vld [vmem:[%s3272_s10 + $0x214] ss:$20 sps:$4 sm:$0xff]   ;;  %v2938_v42 = vld [vmem:[%s3272_s10 + $0x210] ss:$20 sps:$4 sm:$0xff]  }
  0x44   : > { %2567 = vmatpush3.bf16.msra.mxu1 %v2848_v43  ;;  %v2939_v43 = vld [vmem:[%s3272_s10 + $0x1c8] ss:$20 sps:$4 sm:$0xff]  }
  0x45   : > { %2568 = vmatprep.subr.bf16.mxu1 %v2855_v46  ;;  %v2943_v46 = vld [vmem:[%s3272_s10 + $0x238] ss:$20 sps:$4 sm:$0xff]  }
  0x47   : > { %1152 = vmatmul.mubr.bf16.gmra.mrb[12].mxu0 %v2853_v44  ;;  %1248 = vmatmul.mubr.bf16.gmra.mrb[12].mxu1 %v2854_v45  ;;  %v2940_v44 = vld [vmem:[%s3272_s10 + $0x23c] ss:$20 sps:$4 sm:$0xff]  }
  0x48   : > { %2569 = vmatpush3.bf16.msra.mxu1 %v2856_v48  ;;  %1159 = vmatprep.mubr.bf16.mxu0 %v2860_v50  ;;  %v2942_v45 = vld [vmem:[%s3272_s10 + $0x1f0] ss:$20 sps:$4 sm:$0xff]   ;;  %v2948_v50 = vld [vmem:[%s3272_s10 + $0x260] ss:$20 sps:$4 sm:$0xff]  }
  0x49   : > { %2570 = vmatprep.subr.bf16.mxu1 %v2857_v49  ;;  %1288 = vmatprep.mubr.bf16.mxu1 %v2864_v51  ;;  %v2945_v48 = vld [vmem:[%s3272_s10 + $0x264] ss:$20 sps:$4 sm:$0xff]   ;;  %v2947_v49 = vld [vmem:[%s3272_s10 + $0x240] ss:$20 sps:$4 sm:$0xff]   ;;  %v2949_v51 = vld [vmem:[%s3272_s10 + $0x268] ss:$20 sps:$4 sm:$0xff]  }
  0x4c   : > { %2571 = vmatpush3.bf16.msra.mxu1 %v2859_v52 }
  0x4f   : > { %1160 = vmatmul.mubr.bf16.gmra.mrb[16].mxu0 %v2865_v54  ;;  %1289 = vmatmul.mubr.bf16.vlgmr.msra.gmra.mrb[16].mxu1 %v2862_v53 }
  0x50   : > { %1167 = vmatprep.mubr.bf16.mxu0 %v2866_v55  ;;  %1296 = vmatprep.mubr.bf16.mxu1 %v2868_v57 }
  0x57   : > { %1168 = vmatmul.mubr.bf16.gmra.mrb[20].mxu0 %v2870_v58  ;;  %1297 = vmatmul.mubr.bf16.gmra.mrb[20].mxu1 %v2871_v59 }
  0x58   : > { %1175 = vmatprep.mubr.bf16.mxu0 %v2872_v60  ;;  %1304 = vmatprep.mubr.bf16.mxu1 %v2874_v61 }
  0x5f   : > { %1176 = vmatmul.mubr.bf16.gmra.mrb[24].mxu0 %v2876_v62  ;;  %1305 = vmatmul.mubr.bf16.gmra.mrb[24].mxu1 %v2877_v63 }
  0x60   : > { %1183 = vmatprep.mubr.bf16.mxu0 %v2879_v0  ;;  %1312 = vmatprep.mubr.bf16.mxu1 %v2881_v1 }
  0x67   : > { %1184 = vmatmul.mubr.bf16.gmra.mrb[28].mxu0 %v2883_v2  ;;  %1313 = vmatmul.mubr.bf16.gmra.mrb[28].mxu1 %v2884_v3 }
  0x68   : > { %1191 = vmatprep.mubr.bf16.mxu0 %v2885_v4  ;;  %1320 = vmatprep.mubr.bf16.mxu1 %v2887_v5 }
  0x6f   : > { %1192 = vmatmul.mubr.bf16.gmra.mrb[32].mxu0 %v2889_v6  ;;  %1321 = vmatmul.mubr.bf16.gmra.mrb[32].mxu1 %v2890_v7 }
  0x70   : > { %1199 = vmatprep.mubr.bf16.mxu0 %v2891_v8  ;;  %1328 = vmatprep.mubr.bf16.mxu1 %v2893_v9 }
  0x77   : > { %1200 = vmatmul.mubr.bf16.gmra.mrb[36].mxu0 %v2895_v10  ;;  %1329 = vmatmul.mubr.bf16.gmra.mrb[36].mxu1 %v2896_v11 }
  0x78   : > { %1207 = vmatprep.mubr.bf16.mxu0 %v2898_v12  ;;  %1336 = vmatprep.mubr.bf16.mxu1 %v2900_v13 }
  0x7f   : > { %1208 = vmatmul.mubr.bf16.gmra.mrb[40].mxu0 %v2902_v14  ;;  %1337 = vmatmul.mubr.bf16.gmra.mrb[40].mxu1 %v2903_v15 }
  0x80   : > { %1215 = vmatprep.mubr.bf16.mxu0 %v2904_v16  ;;  %1344 = vmatprep.mubr.bf16.mxu1 %v2906_v17 }
  0x87   : > { %1216 = vmatmul.mubr.bf16.gmra.mrb[44].mxu0 %v2908_v18  ;;  %1345 = vmatmul.mubr.bf16.gmra.mrb[44].mxu1 %v2909_v19 }
  0x88   : > { %1352 = vmatprep.mubr.bf16.mxu1 %v2910_v20  ;;  %2696 = vmatprep.mubr.msk.bf16.mxu0 %vm1046_vm0, %v2912_v21 }
  0x8f   : > { %1353 = vmatmul.mubr.bf16.gmra.mrb[48].mxu1 %v2913_v22  ;;  %2697 = vmatmul.mubr.msk.bf16.vlgmr.msra.gmra.mrb[48].mxu0 %vm1046_vm0, %v2914_v23 }
  0x90   : > { %1360 = vmatprep.mubr.bf16.mxu1 %v2915_v24  ;;  %2700 = vmatprep.mubr.msk.bf16.mxu0 %vm1046_vm0, %v2917_v25 }
  0x97   : > { %1361 = vmatmul.mubr.bf16.gmra.mrb[52].mxu1 %v2918_v26  ;;  %2701 = vmatmul.mubr.msk.bf16.gmra.mrb[52].mxu0 %vm1046_vm0, %v2919_v27 }
  0x98   : > { %1368 = vmatprep.mubr.bf16.mxu1 %v2920_v28  ;;  %2704 = vmatprep.mubr.msk.bf16.mxu0 %vm1046_vm0, %v2922_v29 }
  0x9f   : > { %1369 = vmatmul.mubr.bf16.gmra.mrb[56].mxu1 %v2923_v30  ;;  %2705 = vmatmul.mubr.msk.bf16.gmra.mrb[56].mxu0 %vm1046_vm0, %v2924_v31 }
  0xa0   : > { %1376 = vmatprep.mubr.bf16.mxu1 %v2925_v32  ;;  %2708 = vmatprep.mubr.msk.bf16.mxu0 %vm1046_vm0, %v2927_v33 }
  0xa7   : > { %1377 = vmatmul.mubr.bf16.gmra.mrb[60].mxu1 %v2928_v34  ;;  %2709 = vmatmul.mubr.msk.bf16.gmra.mrb[60].mxu0 %vm1046_vm0, %v2929_v35 }
  0xa8   : > { %1384 = vmatprep.mubr.bf16.mxu1 %v2930_v36  ;;  %2712 = vmatprep.mubr.msk.bf16.mxu0 %vm1046_vm0, %v2932_v37 }
  0xaf   : > { %1385 = vmatmul.mubr.bf16.gmra.mrb[64].mxu1 %v2933_v38  ;;  %2713 = vmatmul.mubr.msk.bf16.gmra.mrb[64].mxu0 %vm1046_vm0, %v2934_v39 }
  0xb0   : > { %1392 = vmatprep.mubr.bf16.mxu1 %v2935_v40  ;;  %2716 = vmatprep.mubr.msk.bf16.mxu0 %vm1046_vm0, %v2937_v41 }
  0xb7   : > { %1393 = vmatmul.mubr.bf16.gmra.mrb[68].mxu1 %v2938_v42  ;;  %2717 = vmatmul.mubr.msk.bf16.gmra.mrb[68].mxu0 %vm1046_vm0, %v2939_v43 }
  0xb8   : > { %1400 = vmatprep.mubr.bf16.mxu1 %v2940_v44  ;;  %2720 = vmatprep.mubr.msk.bf16.mxu0 %vm1046_vm0, %v2942_v45 }
  0xbf   : > { %1401 = vmatmul.mubr.bf16.gmra.mrb[72].mxu1 %v2943_v46  ;;  %2721 = vmatmul.mubr.msk.bf16.gmra.mrb[72].mxu0 %vm1046_vm0, %v2944_v47 }
  0xc0   : > { %1408 = vmatprep.mubr.bf16.mxu1 %v2945_v48  ;;  %2724 = vmatprep.mubr.msk.bf16.mxu0 %vm1046_vm0, %v2947_v49 }
  0xc7   : > { %1409 = vmatmul.mubr.bf16.gmra.mrb[76].mxu1 %v2948_v50  ;;  %2725 = vmatmul.mubr.msk.bf16.gmra.mrb[76].mxu0 %vm1046_vm0, %v2949_v51 }
 0x102   : > { %v2532_v52 = vpop.f32.mrb[0].mxu1  ;;  %v2460_v53 = vpop.f32.mrb[0].mxu0 }
 0x103   : > { %v2533_v54 = vpop.f32.mrb[1].mxu1  ;;  %v2461_v55 = vpop.f32.mrb[1].mxu0 }
 0x104   : > { %v3451_v56 = vadd.f32 %v2533_v54, %v2532_v52  ;;  %v2535_v57 = vpop.f32.mrb[2].mxu1  ;;  %v2462_v58 = vadd.f32 %v2461_v55, %v2460_v53  ;;  %v2463_v59 = vpop.f32.mrb[2].mxu0 }
 0x105   : > { %v2536_v60 = vpop.f32.mrb[3].mxu1  ;;  %v2464_v61 = vpop.f32.mrb[3].mxu0 }
 0x106   : > { %v3453_v62 = vadd.f32 %v2536_v60, %v2535_v57  ;;  %v2465_v63 = vadd.f32 %v2464_v61, %v2463_v59 }
 0x10a   : > { %v2538_v0 = vpop.f32.mrb[4].mxu1  ;;  %v2466_v1 = vpop.f32.mrb[4].mxu0 }
 0x10b   : > { %v2539_v2 = vpop.f32.mrb[5].mxu1  ;;  %v2467_v3 = vpop.f32.mrb[5].mxu0 }
 0x10c   : > { %v3455_v4 = vadd.f32 %v2539_v2, %v2538_v0  ;;  %v2541_v5 = vpop.f32.mrb[6].mxu1  ;;  %v2468_v6 = vadd.f32 %v2467_v3, %v2466_v1  ;;  %v2469_v7 = vpop.f32.mrb[6].mxu0 }
 0x10d   : > { %v2542_v8 = vpop.f32.mrb[7].mxu1  ;;  %v2470_v9 = vpop.f32.mrb[7].mxu0 }
 0x10e   : > { %v3457_v10 = vadd.f32 %v2542_v8, %v2541_v5  ;;  %v2471_v11 = vadd.f32 %v2470_v9, %v2469_v7 }
 0x112   : > { %v2544_v12 = vpop.f32.mrb[8].mxu1  ;;  %v2472_v13 = vpop.f32.mrb[8].mxu0 }
 0x113   : > { %v2545_v14 = vpop.f32.mrb[9].mxu1  ;;  %v2473_v15 = vpop.f32.mrb[9].mxu0 }
 0x114   : > { %v3459_v16 = vadd.f32 %v2545_v14, %v2544_v12  ;;  %v2547_v17 = vpop.f32.mrb[10].mxu1  ;;  %v2474_v18 = vadd.f32 %v2473_v15, %v2472_v13  ;;  %v2475_v19 = vpop.f32.mrb[10].mxu0 }
 0x115   : > { %v2548_v20 = vpop.f32.mrb[11].mxu1  ;;  %v2476_v21 = vpop.f32.mrb[11].mxu0 }
 0x116   : > { %v3461_v22 = vadd.f32 %v2548_v20, %v2547_v17  ;;  %v2477_v23 = vadd.f32 %v2476_v21, %v2475_v19 }
 0x11a   : > { %v2550_v24 = vpop.f32.mrb[12].mxu1  ;;  %v2478_v25 = vpop.f32.mrb[12].mxu0 }
 0x11b   : > { %v2551_v26 = vpop.f32.mrb[13].mxu1  ;;  %v2479_v27 = vpop.f32.mrb[13].mxu0 }
 0x11c   : > { %v3463_v28 = vadd.f32 %v2551_v26, %v2550_v24  ;;  %v2553_v29 = vpop.f32.mrb[14].mxu1  ;;  %v2480_v30 = vadd.f32 %v2479_v27, %v2478_v25  ;;  %v2481_v31 = vpop.f32.mrb[14].mxu0 }
 0x11d   : > { %v2554_v32 = vpop.f32.mrb[15].mxu1  ;;  %v2482_v33 = vpop.f32.mrb[15].mxu0 }
 0x11e   : > { %v3465_v34 = vadd.f32 %v2554_v32, %v2553_v29  ;;  %v2483_v35 = vadd.f32 %v2482_v33, %v2481_v31 }
 0x122   : > { %v2572_v36 = vpop.f32.mrb[16].mxu1  ;;  %v2484_v37 = vpop.f32.mrb[16].mxu0 }
 0x123   : > { %v2573_v38 = vpop.f32.mrb[17].mxu1  ;;  %v2485_v39 = vpop.f32.mrb[17].mxu0 }
 0x124   : > { %v2574_v40 = vadd.f32 %v2573_v38, %v2572_v36  ;;  %v2575_v41 = vpop.f32.mrb[18].mxu1  ;;  %v2486_v42 = vadd.f32 %v2485_v39, %v2484_v37  ;;  %v2487_v43 = vpop.f32.mrb[18].mxu0 }
 0x125   : > { %v2576_v44 = vpop.f32.mrb[19].mxu1  ;;  %v2488_v45 = vpop.f32.mrb[19].mxu0 }
 0x126   : > { %v2577_v46 = vadd.f32 %v2576_v44, %v2575_v41  ;;  %v2489_v47 = vadd.f32 %v2488_v45, %v2487_v43  ;;  %v3467_v48 = vadd.f32 %v2574_v40, %v2462_v58 }
 0x128   : > { %v3469_v49 = vadd.f32 %v2577_v46, %v2465_v63 }
 0x12a   : > { %v2578_v50 = vpop.f32.mrb[20].mxu1  ;;  %v2490_v51 = vpop.f32.mrb[20].mxu0 }
 0x12b   : > { %v2579_v52 = vpop.f32.mrb[21].mxu1  ;;  %v2491_v53 = vpop.f32.mrb[21].mxu0 }
 0x12c   : > { %v2580_v54 = vadd.f32 %v2579_v52, %v2578_v50  ;;  %v2581_v55 = vpop.f32.mrb[22].mxu1  ;;  %v2492_v57 = vadd.f32 %v2491_v53, %v2490_v51  ;;  %v2493_v59 = vpop.f32.mrb[22].mxu0 }
 0x12d   : > { %v2582_v60 = vpop.f32.mrb[23].mxu1  ;;  %v2494_v61 = vpop.f32.mrb[23].mxu0 }
 0x12e   : > { %v2583_v0 = vadd.f32 %v2582_v60, %v2581_v55  ;;  %v2495_v1 = vadd.f32 %v2494_v61, %v2493_v59  ;;  %v3471_v2 = vadd.f32 %v2580_v54, %v2468_v6 }
 0x130   : > { %v3473_v3 = vadd.f32 %v2583_v0, %v2471_v11 }
 0x132   : > { %v2584_v58 = vpop.f32.mrb[24].mxu1  ;;  %v2496_v5 = vpop.f32.mrb[24].mxu0 }
 0x133   : > { %v2585_v63 = vpop.f32.mrb[25].mxu1  ;;  %v2497_v7 = vpop.f32.mrb[25].mxu0 }
 0x134   : > { %v2586_v8 = vadd.f32 %v2585_v63, %v2584_v58  ;;  %v2587_v9 = vpop.f32.mrb[26].mxu1  ;;  %v2498_v12 = vadd.f32 %v2497_v7, %v2496_v5  ;;  %v2499_v13 = vpop.f32.mrb[26].mxu0 }
 0x135   : > { %v2588_v14 = vpop.f32.mrb[27].mxu1  ;;  %v2500_v15 = vpop.f32.mrb[27].mxu0 }
 0x136   : > { %v2589_v17 = vadd.f32 %v2588_v14, %v2587_v9  ;;  %v2501_v19 = vadd.f32 %v2500_v15, %v2499_v13  ;;  %v3475_v20 = vadd.f32 %v2586_v8, %v2474_v18 }
 0x138   : > { %v3477_v21 = vadd.f32 %v2589_v17, %v2477_v23 }
 0x13a   : > { %v2590_v6 = vpop.f32.mrb[28].mxu1  ;;  %v2502_v24 = vpop.f32.mrb[28].mxu0 }
 0x13b   : > { %v2591_v11 = vpop.f32.mrb[29].mxu1  ;;  %v2503_v25 = vpop.f32.mrb[29].mxu0 }
 0x13c   : > { %v2592_v26 = vadd.f32 %v2591_v11, %v2590_v6  ;;  %v2593_v27 = vpop.f32.mrb[30].mxu1  ;;  %v2504_v29 = vadd.f32 %v2503_v25, %v2502_v24  ;;  %v2505_v31 = vpop.f32.mrb[30].mxu0 }
 0x13d   : > { %v2594_v32 = vpop.f32.mrb[31].mxu1  ;;  %v2506_v33 = vpop.f32.mrb[31].mxu0 }
 0x13e   : > { %v2595_v36 = vadd.f32 %v2594_v32, %v2593_v27  ;;  %v2507_v37 = vadd.f32 %v2506_v33, %v2505_v31  ;;  %v3479_v38 = vadd.f32 %v2592_v26, %v2480_v30 }
 0x140   : > { %v3481_v39 = vadd.f32 %v2595_v36, %v2483_v35 }
 0x142   : > { %v2596_v18 = vpop.f32.mrb[32].mxu1  ;;  %v2508_v40 = vpop.f32.mrb[32].mxu0 }
 0x143   : > { %v2597_v23 = vpop.f32.mrb[33].mxu1  ;;  %v2509_v41 = vpop.f32.mrb[33].mxu0 }
 0x144   : > { %v2598_v43 = vadd.f32 %v2597_v23, %v2596_v18  ;;  %v2599_v44 = vpop.f32.mrb[34].mxu1  ;;  %v3483_v45 = vadd.f32 %v2509_v41, %v2508_v40  ;;  %v2511_v46 = vpop.f32.mrb[34].mxu0 }
 0x145   : > { %v2600_v50 = vpop.f32.mrb[35].mxu1  ;;  %v2512_v51 = vpop.f32.mrb[35].mxu0 }
 0x146   : > { %v2601_v52 = vadd.f32 %v2600_v50, %v2599_v44  ;;  %v3485_v53 = vadd.f32 %v2512_v51, %v2511_v46  ;;  %v3487_v54 = vadd.f32 %v2598_v43, %v2486_v42 }
 0x148   : > { %v3489_v30 = vadd.f32 %v2601_v52, %v2489_v47 }
 0x14a   : > { %v2602_v35 = vpop.f32.mrb[36].mxu1  ;;  %v2514_v55 = vpop.f32.mrb[36].mxu0 }
 0x14b   : > { %v2603_v59 = vpop.f32.mrb[37].mxu1  ;;  %v2515_v60 = vpop.f32.mrb[37].mxu0 }
 0x14c   : > { %v2604_v61 = vadd.f32 %v2603_v59, %v2602_v35  ;;  %v2605_v0 = vpop.f32.mrb[38].mxu1  ;;  %v3491_v58 = vadd.f32 %v2515_v60, %v2514_v55  ;;  %v2517_v5 = vpop.f32.mrb[38].mxu0  ;;  %v3518_v59 = vld [vmem:[%s3898_s2] ss:$0 sm:$0xff] }
 0x14d   : > { %v2606_v63 = vpop.f32.mrb[39].mxu1  ;;  %v2518_v7 = vpop.f32.mrb[39].mxu0 }
 0x14e   : > { %v2607_v8 = vadd.f32 %v2606_v63, %v2605_v0  ;;  %v3493_v9 = vadd.f32 %v2518_v7, %v2517_v5  ;;  %v3495_v13 = vadd.f32 %v2604_v61, %v2492_v57  ;;  %v3524_v5 = vld [vmem:[%s3899_s3] ss:$0 sm:$0xff] }
 0x150   : > { %v3497_v42 = vadd.f32 %v2607_v8, %v2495_v1 }
 0x152   : > { %v2608_v47 = vpop.f32.mrb[40].mxu1  ;;  %v2520_v14 = vpop.f32.mrb[40].mxu0 }
 0x153   : > { %v2609_v15 = vpop.f32.mrb[41].mxu1  ;;  %v2521_v17 = vpop.f32.mrb[41].mxu0 }
 0x154   : > { %v2610_v6 = vadd.f32 %v2609_v15, %v2608_v47  ;;  %v2611_v24 = vpop.f32.mrb[42].mxu1  ;;  %v3499_v11 = vadd.f32 %v2521_v17, %v2520_v14  ;;  %v2523_v25 = vpop.f32.mrb[42].mxu0 }
 0x155   : > { %v2612_v26 = vpop.f32.mrb[43].mxu1  ;;  %v2524_v27 = vpop.f32.mrb[43].mxu0 }
 0x156   : > { %v2613_v31 = vadd.f32 %v2612_v26, %v2611_v24  ;;  %v3501_v32 = vadd.f32 %v2524_v27, %v2523_v25  ;;  %v3503_v33 = vadd.f32 %v2610_v6, %v2498_v12 }
 0x158   : > { %v3505_v57 = vadd.f32 %v2613_v31, %v2501_v19 }
 0x15a   : > { %v2614_v1 = vpop.f32.mrb[44].mxu1  ;;  %v2526_v36 = vpop.f32.mrb[44].mxu0 }
 0x15b   : > { %v2615_v18 = vpop.f32.mrb[45].mxu1  ;;  %v2527_v40 = vpop.f32.mrb[45].mxu0 }
 0x15c   : > { %v2616_v23 = vadd.f32 %v2615_v18, %v2614_v1  ;;  %v2617_v41 = vpop.f32.mrb[46].mxu1  ;;  %v3507_v43 = vadd.f32 %v2527_v40, %v2526_v36  ;;  %v2529_v44 = vpop.f32.mrb[46].mxu0 }
 0x15d   : > { %v2618_v46 = vpop.f32.mrb[47].mxu1  ;;  %v2530_v50 = vpop.f32.mrb[47].mxu0 }
 0x15e   : > { %v2619_v51 = vadd.f32 %v2618_v46, %v2617_v41  ;;  %v3509_v52 = vadd.f32 %v2530_v50, %v2529_v44  ;;  %v3511_v35 = vadd.f32 %v2616_v23, %v2504_v29 }
 0x160   : > { %v3513_v12 = vadd.f32 %v2619_v51, %v2507_v37 }
 0x162   : > { %v2620_v19 = vpop.f32.mrb[48].mxu1  ;;  %v2698_v55 = vpop.f32.mrb[48].mxu0 }
 0x163   : > { %v1460_v60 = vadd.f32 %v2698_v55, %v3471_v2  ;;  %v2621_v61 = vpop.f32.mrb[49].mxu1  ;;  %v1451_v0 = vpop.f32.mrb[49].mxu0 }
 0x164   : > { %v2622_v29 = vadd.f32 %v2621_v61, %v2620_v19  ;;  %v1452_v37 = vadd.f32 %v1451_v0, %v3467_v48  ;;  %v2623_v63 = vpop.f32.mrb[50].mxu1  ;;  %v2699_v7 = vpop.f32.mrb[50].mxu0 }
 0x165   : > { %v1587_v8 = vmul.f32 %v3518_v59, %v1460_v60  ;;  %v1463_v47 = vadd.f32 %v2699_v7, %v3473_v3  ;;  %v2624_v14 = vpop.f32.mrb[51].mxu1  ;;  %v1454_v15 = vpop.f32.mrb[51].mxu0 }
 0x166   : > { %v1585_v2 = vmul.f32 %v3518_v59, %v1452_v37  ;;  %v2625_v17 = vadd.f32 %v2624_v14, %v2623_v63  ;;  %v1455_v6 = vadd.f32 %v1454_v15, %v3469_v49  ;;  %v3532_v24 = vadd.f32 %v2622_v29, %v3483_v45 }
 0x167   : > { %v3535_v25 = vadd.f32 %v3524_v5, %v1587_v8  ;;  %v1588_v48 = vmul.f32 %v3518_v59, %v1463_v47 }
 0x168   : > { %v3539_v26 = vadd.f32 %v3524_v5, %v1585_v2  ;;  %v1586_v3 = vmul.f32 %v3518_v59, %v1455_v6  ;;  %v3543_v27 = vadd.f32 %v2625_v17, %v3485_v53 }
 0x169   : > { %v1658_v31 = vsub.f32 0.0, %v3535_v25  ;;  %v3547_v49 = vadd.f32 %v3524_v5, %v1588_v48 }
 0x16a   : > { %v1656_v45 = vsub.f32 0.0, %v3539_v26  ;;  %v3551_v1 = vadd.f32 %v3524_v5, %v1586_v3  ;;  %v2626_v36 = vpop.f32.mrb[52].mxu1  ;;  %v2702_v18 = vpop.f32.mrb[52].mxu0 }
 0x16b   : > { %v1692_v40 = vmul.f32 1.442695, %v1658_v31  ;;  %v1659_v23 = vsub.f32 0.0, %v3547_v49  ;;  %v1476_v41 = vadd.f32 %v2702_v18, %v3479_v38  ;;  %v2627_v44 = vpop.f32.mrb[53].mxu1  ;;  %v1467_v53 = vpop.f32.mrb[53].mxu0 }
 0x16c   : > { %v1688_v46 = vmul.f32 1.442695, %v1656_v45  ;;  %v1657_v50 = vsub.f32 0.0, %v3551_v1  ;;  %v2628_v51 = vadd.f32 %v2627_v44, %v2626_v36  ;;  %v1468_v19 = vadd.f32 %v1467_v53, %v3475_v20  ;;  %v2629_v55 = vpop.f32.mrb[54].mxu1  ;;  %v2703_v60 = vpop.f32.mrb[54].mxu0 }
 0x16d   : > { %2950 = vpow2.f32 %v1692_v40  ;;  %v1694_v61 = vmul.f32 1.442695, %v1659_v23  ;;  %v1591_v0 = vmul.f32 %v3518_v59, %v1476_v41  ;;  %v1479_v29 = vadd.f32 %v2703_v60, %v3481_v39  ;;  %v2630_v37 = vpop.f32.mrb[55].mxu1  ;;  %v1470_v63 = vpop.f32.mrb[55].mxu0 }
 0x16e   : > { %2952 = vpow2.f32 %v1688_v46  ;;  %v1690_v38 = vmul.f32 1.442695, %v1657_v50  ;;  %v1589_v7 = vmul.f32 %v3518_v59, %v1468_v19  ;;  %v2631_v8 = vadd.f32 %v2630_v37, %v2629_v55 }
 0x16f   : > { %2954 = vpow2.f32 %v1694_v61  ;;  %v3561_v47 = vadd.f32 %v3524_v5, %v1591_v0  ;;  %v1592_v20 = vmul.f32 %v3518_v59, %v1479_v29  ;;  %v1471_v14 = vadd.f32 %v1470_v63, %v3477_v21 }
 0x170   : > { %2956 = vpow2.f32 %v1690_v38  ;;  %v3566_v15 = vadd.f32 %v3524_v5, %v1589_v7  ;;  %v3569_v39 = vadd.f32 %v2628_v51, %v3491_v58  ;;  %v3572_v2 = vadd.f32 %v2631_v8, %v3493_v9 }
 0x171   : > { %v1662_v17 = vsub.f32 0.0, %v3561_v47  ;;  %v3576_v6 = vadd.f32 %v3524_v5, %v1592_v20  ;;  %v1590_v48 = vmul.f32 %v3518_v59, %v1471_v14 }
 0x172   : > { %v1660_v3 = vsub.f32 0.0, %v3566_v15  ;;  %v2632_v21 = vpop.f32.mrb[56].mxu1  ;;  %v2706_v31 = vpop.f32.mrb[56].mxu0 }
 0x173   : > { %v1700_v45 = vmul.f32 1.442695, %v1662_v17  ;;  %v1663_v36 = vsub.f32 0.0, %v3576_v6  ;;  %v3582_v58 = vadd.f32 %v3524_v5, %v1590_v48  ;;  %v1492_v9 = vadd.f32 %v2706_v31, %v3495_v13  ;;  %v2633_v18 = vpop.f32.mrb[57].mxu1  ;;  %v1483_v40 = vpop.f32.mrb[57].mxu0 }
 0x174   : > { %v1696_v23 = vmul.f32 1.442695, %v1660_v3  ;;  %v2634_v41 = vadd.f32 %v2633_v18, %v2632_v21  ;;  %v1484_v44 = vadd.f32 %v1483_v40, %v3487_v54  ;;  %v2635_v53 = vpop.f32.mrb[58].mxu1  ;;  %v2707_v46 = vpop.f32.mrb[58].mxu0 }
 0x175   : > { %2958 = vpow2.f32 %v1700_v45  ;;  %v1702_v50 = vmul.f32 1.442695, %v1663_v36  ;;  %v1661_v51 = vsub.f32 0.0, %v3582_v58  ;;  %v1595_v19 = vmul.f32 %v3518_v59, %v1492_v9  ;;  %v2636_v55 = vpop.f32.mrb[59].mxu1  ;;  %v1486_v60 = vpop.f32.mrb[59].mxu0 }
 0x176   : > { %2960 = vpow2.f32 %v1696_v23  ;;  %v1593_v61 = vmul.f32 %v3518_v59, %v1484_v44  ;;  %v1495_v13 = vadd.f32 %v2707_v46, %v3497_v42  ;;  %v3590_v0 = vadd.f32 %v2636_v55, %v2635_v53 }
 0x177   : > { %v2951_v29 = vpop.eup %2950  ;;  %2962 = vpow2.f32 %v1702_v50  ;;  %v1698_v54 = vmul.f32 1.442695, %v1661_v51  ;;  %v3593_v37 = vadd.f32 %v3524_v5, %v1595_v19  ;;  %v1487_v63 = vadd.f32 %v1486_v60, %v3489_v30 }
 0x178   : > { %v2953_v38 = vpop.eup %2952  ;;  %v1754_v7 = vadd.f32 1.0, %v2951_v29  ;;  %v3597_v8 = vadd.f32 %v3524_v5, %v1593_v61  ;;  %v1596_v20 = vmul.f32 %v3518_v59, %v1495_v13  ;;  %v3601_v14 = vadd.f32 %v2634_v41, %v3499_v11 }
 0x179   : > { %v2955_v42 = vpop.eup %2954  ;;  %v1752_v17 = vadd.f32 1.0, %v2953_v38  ;;  %2964 = vpow2.f32 %v1698_v54  ;;  %v1666_v48 = vsub.f32 0.0, %v3593_v37  ;;  %v1594_v3 = vmul.f32 %v3518_v59, %v1487_v63 }
 0x17a   : > { %v2957_v21 = vpop.eup %2956  ;;  %2966 = vrcp.f32 %v1754_v7  ;;  %v1755_v30 = vadd.f32 1.0, %v2955_v42  ;;  %v1664_v31 = vsub.f32 0.0, %v3597_v8  ;;  %v3607_v45 = vadd.f32 %v3524_v5, %v1596_v20  ;;  %v2638_v36 = vpop.f32.mrb[60].mxu1 }
 0x17b   : > { %v2710_v9 = vpop.f32.mrb[60].mxu0  ;;  %2968 = vrcp.f32 %v1752_v17  ;;  %v1753_v11 = vadd.f32 1.0, %v2957_v21  ;;  %v1708_v18 = vmul.f32 1.442695, %v1666_v48  ;;  %v3610_v40 = vadd.f32 %v3524_v5, %v1594_v3  ;;  %v2639_v23 = vpop.f32.mrb[61].mxu1 }
 0x17c   : > { %v1499_v41 = vpop.f32.mrb[61].mxu0  ;;  %2970 = vrcp.f32 %v1755_v30  ;;  %v1704_v44 = vmul.f32 1.442695, %v1664_v31  ;;  %v1667_v53 = vsub.f32 0.0, %v3607_v45  ;;  %v1508_v46 = vadd.f32 %v2710_v9, %v3511_v35  ;;  %v2641_v50 = vpop.f32.mrb[62].mxu1 }
 0x17d   : > { %v2711_v51 = vpop.f32.mrb[62].mxu0  ;;  %2972 = vrcp.f32 %v1753_v11  ;;  %v1665_v19 = vsub.f32 0.0, %v3610_v40  ;;  %v3615_v55 = vadd.f32 %v2639_v23, %v2638_v36  ;;  %v1500_v60 = vadd.f32 %v1499_v41, %v3503_v33  ;;  %v2642_v61 = vpop.f32.mrb[63].mxu1 }
 0x17e   : > { %v1502_v13 = vpop.f32.mrb[63].mxu0  ;;  %2974 = vpow2.f32 %v1708_v18  ;;  %v1710_v29 = vmul.f32 1.442695, %v1667_v53  ;;  %v1599_v54 = vmul.f32 %v3518_v59, %v1508_v46  ;;  %v1511_v63 = vadd.f32 %v2711_v51, %v3513_v12 }
 0x17f   : > { %v2959_v38 = vpop.eup %2958  ;;  %2976 = vpow2.f32 %v1704_v44  ;;  %v1706_v35 = vmul.f32 1.442695, %v1665_v19  ;;  %v1597_v7 = vmul.f32 %v3518_v59, %v1500_v60  ;;  %v3621_v20 = vadd.f32 %v2642_v61, %v2641_v50 }
 0x180   : > { %v2961_v42 = vpop.eup %2960  ;;  %v1758_v17 = vadd.f32 1.0, %v2959_v38  ;;  %2978 = vpow2.f32 %v1710_v29  ;;  %v3624_v33 = vadd.f32 %v3524_v5, %v1599_v54  ;;  %v1600_v48 = vmul.f32 %v3518_v59, %v1511_v63 }
 0x181   : > { %v2963_v3 = vpop.eup %2962  ;;  %v1756_v21 = vadd.f32 1.0, %v2961_v42  ;;  %2980 = vpow2.f32 %v1706_v35  ;;  %v3628_v12 = vadd.f32 %v3524_v5, %v1597_v7  ;;  %v1503_v30 = vadd.f32 %v1502_v13, %v3505_v57 }
 0x182   : > { %2982 = vrcp.f32 %v1758_v17  ;;  %v1759_v31 = vadd.f32 1.0, %v2963_v3  ;;  %v1670_v36 = vsub.f32 0.0, %v3624_v33  ;;  %v3634_v9 = vadd.f32 %v3524_v5, %v1600_v48  ;;  %v2644_v11 = vpop.f32.mrb[64].mxu1  ;;  %v2714_v18 = vpop.f32.mrb[64].mxu0 }
 0x183   : > { %v2965_v23 = vpop.eup %2964  ;;  %2984 = vrcp.f32 %v1756_v21  ;;  %v1668_v41 = vsub.f32 0.0, %v3628_v12  ;;  %v1598_v44 = vmul.f32 %v3518_v59, %v1503_v30  ;;  %v1524_v53 = vadd.f32 %v2714_v18, %v3569_v39  ;;  %v2645_v57 = vpop.f32.mrb[65].mxu1 }
 0x184   : > { %v1515_v46 = vpop.f32.mrb[65].mxu0  ;;  %v2967_v50 = vpop.eup %2966  ;;  %2986 = vrcp.f32 %v1759_v31  ;;  %v1757_v51 = vadd.f32 1.0, %v2965_v23  ;;  %v1716_v19 = vmul.f32 1.442695, %v1670_v36  ;;  %v1671_v60 = vsub.f32 0.0, %v3634_v9 }
 0x185   : > { %v2647_v61 = vpop.f32.mrb[66].mxu1  ;;  %v2715_v13 = vpop.f32.mrb[66].mxu0  ;;  %v1818_v54 = vmul.f32 %v2967_v50, %v3535_v25  ;;  %v1712_v63 = vmul.f32 1.442695, %v1668_v41  ;;  %v3646_v38 = vadd.f32 %v3524_v5, %v1598_v44  ;;  %v1603_v39 = vmul.f32 %v3518_v59, %v1524_v53 }
 0x186   : > { %v2969_v29 = vpop.eup %2968  ;;  %v2648_v35 = vpop.f32.mrb[67].mxu1  ;;  %2988 = vrcp.f32 %v1757_v51  ;;  %v1718_v48 = vmul.f32 1.442695, %v1671_v60  ;;  %v3650_v3 = vadd.f32 %v2645_v57, %v2644_v11  ;;  %v1527_v23 = vadd.f32 %v2715_v13, %v3572_v2 }
 0x187   : > { %v1518_v7 = vpop.f32.mrb[67].mxu0  ;;  %v2971_v42 = vpop.eup %2970  ;;  %v1816_v17 = vmul.f32 %v2969_v29, %v3539_v26  ;;  %2990 = vpow2.f32 %v1716_v19  ;;  %v1669_v30 = vsub.f32 0.0, %v3646_v38  ;;  %v3655_v31 = vadd.f32 %v3524_v5, %v1603_v39 }
 0x188   : > { %v2973_v21 = vpop.eup %2972  ;;  %v1819_v25 = vmul.f32 %v2971_v42, %v3547_v49  ;;  %2992 = vpow2.f32 %v1712_v63  ;;  %v1516_v26 = vadd.f32 %v1515_v46, %v3532_v24  ;;  %v1604_v2 = vmul.f32 %v3518_v59, %v1527_v23 }
 0x189   : > { %v2975_v36 = vpop.eup %2974  ;;  %v1817_v18 = vmul.f32 %v2973_v21, %v3551_v1  ;;  %2994 = vpow2.f32 %v1718_v48  ;;  %v1714_v49 = vmul.f32 1.442695, %v1669_v30  ;;  %v1674_v51 = vsub.f32 0.0, %v3655_v31 }
 0x18a   : > { %v2977_v11 = vpop.eup %2976  ;;  %v2357_v41 = vpack.c.bf16 %v1819_v25, %v1818_v54  ;;  %v1762_v44 = vadd.f32 1.0, %v2975_v36  ;;  %v1601_v19 = vmul.f32 %v3518_v59, %v1516_v26  ;;  %v2650_v60 = vpop.f32.mrb[68].mxu1  ;;  %v3667_v46 = vadd.f32 %v2648_v35, %v2647_v61 }
 0x18b   : > { %v2979_v53 = vpop.eup %2978  ;;  %v2352_v57 = vpack.c.bf16 %v1817_v18, %v1816_v17  ;;  %v1760_v50 = vadd.f32 1.0, %v2977_v11  ;;  %v2718_v1 = vpop.f32.mrb[68].mxu0  ;;  %v1724_v42 = vmul.f32 1.442695, %v1674_v51  ;;  %v3677_v61 = vadd.f32 %v3524_v5, %v1604_v2 }
 0x18c   : > { %v2981_v29 = vpop.eup %2980  ;;  %2429 = vst [vmem:[%s3663_s9 + $0x8] sm:$0xff] %v2357_v41   ;;  %2996 = vrcp.f32 %v1762_v44  ;;  %v1763_v24 = vadd.f32 1.0, %v2979_v53  ;;  %v2651_v13 = vpop.f32.mrb[69].mxu1  ;;  %v3671_v17 = vadd.f32 %v3524_v5, %v1601_v19  ;;  %v1519_v35 = vadd.f32 %v1518_v7, %v3543_v27 }
 0x18d   : > { %v1531_v54 = vpop.f32.mrb[69].mxu0  ;;  %v2983_v63 = vpop.eup %2982  ;;  %2353 = vst [vmem:[%s3663_s9] sm:$0xff] %v2352_v57   ;;  %2998 = vrcp.f32 %v1760_v50  ;;  %v1761_v39 = vadd.f32 1.0, %v2981_v29  ;;  %v1379_v41 = vadd.f32 %v3615_v55, %v3507_v43  ;;  %v1675_v44 = vsub.f32 0.0, %v3677_v61 }
 0x18e   : > { %v2653_v48 = vpop.f32.mrb[70].mxu1  ;;  %v3673_v21 = vpop.f32.mrb[70].mxu0  ;;  %v1822_v30 = vmul.f32 %v2983_v63, %v3561_v47  ;;  %3000 = vrcp.f32 %v1763_v24  ;;  %v1672_v11 = vsub.f32 0.0, %v3671_v17  ;;  %v1602_v53 = vmul.f32 %v3518_v59, %v1519_v35 }
 0x18f   : > { %v2985_v25 = vpop.eup %2984  ;;  %v2654_v36 = vpop.f32.mrb[71].mxu1  ;;  %3002 = vrcp.f32 %v1761_v39  ;;  %v1540_v57 = vadd.f32 %v2718_v1, %v1379_v41  ;;  %v2652_v50 = vadd.f32 %v2651_v13, %v2650_v60  ;;  %v1726_v29 = vmul.f32 1.442695, %v1675_v44 }
 0x190   : > { %v3680_v18 = vpop.f32.mrb[71].mxu0  ;;  %v2987_v26 = vpop.eup %2986  ;;  %v1820_v23 = vmul.f32 %v2985_v25, %v3566_v15  ;;  %3004 = vpow2.f32 %v1714_v49  ;;  %v1720_v7 = vmul.f32 1.442695, %v1672_v11  ;;  %v3691_v43 = vadd.f32 %v3524_v5, %v1602_v53 }
 0x191   : > { %v1823_v47 = vmul.f32 %v2987_v26, %v3576_v6  ;;  %v2989_v27 = vpop.eup %2988  ;;  %3006 = vpow2.f32 %v1724_v42  ;;  %v1607_v49 = vmul.f32 %v3518_v59, %v1540_v57  ;;  %v1532_v24 = vadd.f32 %v1531_v54, %v3601_v14 }
 0x192   : > { %v2991_v15 = vpop.eup %2990  ;;  %v1821_v19 = vmul.f32 %v2989_v27, %v3582_v58  ;;  %3008 = vpow2.f32 %v1720_v7  ;;  %v2656_v2 = vpop.f32.mrb[72].mxu1  ;;  %v1673_v58 = vsub.f32 0.0, %v3691_v43  ;;  %v1382_v11 = vadd.f32 %v3621_v20, %v3509_v52 }
 0x193   : > { %v2367_v51 = vpack.c.bf16 %v1823_v47, %v1822_v30  ;;  %v2993_v6 = vpop.eup %2992  ;;  %v1766_v55 = vadd.f32 1.0, %v2991_v15  ;;  %v2722_v63 = vpop.f32.mrb[72].mxu0  ;;  %3010 = vpow2.f32 %v1726_v29  ;;  %v3700_v30 = vadd.f32 %v3524_v5, %v1607_v49 }
 0x194   : > { %v2995_v1 = vpop.eup %2994  ;;  %v2362_v60 = vpack.c.bf16 %v1821_v19, %v1820_v23  ;;  %v1764_v13 = vadd.f32 1.0, %v2993_v6  ;;  %v2657_v39 = vpop.f32.mrb[73].mxu1  ;;  %v1605_v14 = vmul.f32 %v3518_v59, %v1532_v24  ;;  %v1722_v23 = vmul.f32 1.442695, %v1673_v58 }
 0x195   : > { %2431 = vst [vmem:[%s3663_s9 + $0x18] sm:$0xff] %v2367_v51   ;;  %v3697_v42 = vpop.f32.mrb[73].mxu0  ;;  %3012 = vrcp.f32 %v1766_v55  ;;  %v1767_v25 = vadd.f32 1.0, %v2995_v1  ;;  %v3703_v54 = vpop.f32.mrb[74].mxu1  ;;  %v2655_v41 = vadd.f32 %v2654_v36, %v2653_v48  ;;  %v1678_v7 = vsub.f32 0.0, %v3700_v30 }
 0x196   : > { %v3705_v35 = vpop.f32.mrb[74].mxu0  ;;  %v2997_v26 = vpop.eup %2996  ;;  %2430 = vst [vmem:[%s3663_s9 + $0x10] sm:$0xff] %v2362_v60   ;;  %3014 = vrcp.f32 %v1764_v13  ;;  %v3717_v57 = vadd.f32 %v3524_v5, %v1605_v14  ;;  %v1543_v52 = vadd.f32 %v3673_v21, %v1382_v11  ;;  %v1374_v20 = vadd.f32 %v3590_v0, %v3501_v32 }
 0x197   : > { %v3710_v47 = vpop.f32.mrb[75].mxu1  ;;  %v3712_v44 = vpop.f32.mrb[75].mxu0  ;;  %v1826_v27 = vmul.f32 %v2997_v26, %v3593_v37  ;;  %3016 = vrcp.f32 %v1767_v25  ;;  %v1732_v19 = vmul.f32 1.442695, %v1678_v7  ;;  %v1395_v29 = vadd.f32 %v2652_v50, %v3455_v4 }
 0x198   : > { %v2999_v53 = vpop.eup %2998  ;;  %3018 = vpow2.f32 %v1722_v23  ;;  %v1676_v37 = vsub.f32 0.0, %v3717_v57  ;;  %v1608_v49 = vmul.f32 %v3518_v59, %v1543_v52  ;;  %v3729_v21 = vadd.f32 %v2657_v39, %v2656_v2 }
 0x199   : > { %v3001_v15 = vpop.eup %3000  ;;  %v1824_v51 = vmul.f32 %v2999_v53, %v3597_v8  ;;  %v1535_v8 = vadd.f32 %v3680_v18, %v1374_v20  ;;  %3020 = vpow2.f32 %v1732_v19  ;;  %v1556_v39 = vadd.f32 %v2722_v63, %v1395_v29 }
 0x19a   : > { %v3003_v48 = vpop.eup %3002  ;;  %v1827_v36 = vmul.f32 %v3001_v15, %v3607_v45  ;;  %v1728_v45 = vmul.f32 1.442695, %v1676_v37  ;;  %v2662_v1 = vpop.f32.mrb[76].mxu1  ;;  %v1387_v25 = vadd.f32 %v3650_v3, %v3451_v56  ;;  %v1398_v14 = vadd.f32 %v2655_v41, %v3457_v10 }
 0x19b   : > { %v3005_v6 = vpop.eup %3004  ;;  %v1825_v55 = vmul.f32 %v3003_v48, %v3610_v40  ;;  %v3731_v60 = vpop.f32.mrb[76].mxu0  ;;  %v3734_v40 = vadd.f32 %v3524_v5, %v1608_v49  ;;  %v1606_v13 = vmul.f32 %v3518_v59, %v1535_v8  ;;  %v1611_v56 = vmul.f32 %v3518_v59, %v1556_v39 }
 0x19c   : > { %v3007_v24 = vpop.eup %3006  ;;  %v2377_v32 = vpack.c.bf16 %v1827_v36, %v1826_v27  ;;  %v1765_v0 = vadd.f32 1.0, %v3005_v6  ;;  %v2663_v18 = vpop.f32.mrb[77].mxu1  ;;  %v1548_v10 = vadd.f32 %v3697_v42, %v1387_v25 }
 0x19d   : > { %v2372_v4 = vpack.c.bf16 %v1825_v55, %v1824_v51  ;;  %v1770_v50 = vadd.f32 1.0, %v3007_v24  ;;  %v3737_v58 = vpop.f32.mrb[77].mxu0  ;;  %v3009_v2 = vpop.eup %3008  ;;  %v1679_v27 = vsub.f32 0.0, %v3734_v40  ;;  %v3748_v7 = vadd.f32 %v3524_v5, %v1606_v13 }
 0x19e   : > { %2433 = vst [vmem:[%s3663_s9 + $0x28] sm:$0xff] %v2377_v32   ;;  %3022 = vrcp.f32 %v1765_v0  ;;  %v2665_v26 = vpop.f32.mrb[78].mxu1  ;;  %v3743_v23 = vpop.f32.mrb[78].mxu0  ;;  %v1768_v53 = vadd.f32 1.0, %v3009_v2  ;;  %v3758_v37 = vadd.f32 %v3524_v5, %v1611_v56  ;;  %v1609_v29 = vmul.f32 %v3518_v59, %v1548_v10 }
 0x19f   : > { %v3011_v11 = vpop.eup %3010  ;;  %2432 = vst [vmem:[%s3663_s9 + $0x20] sm:$0xff] %v2372_v4   ;;  %3024 = vrcp.f32 %v1770_v50  ;;  %v2666_v15 = vpop.f32.mrb[79].mxu1  ;;  %v1734_v20 = vmul.f32 1.442695, %v1679_v27  ;;  %v1677_v48 = vsub.f32 0.0, %v3748_v7  ;;  %v2664_v50 = vadd.f32 %v2663_v18, %v2662_v1 }
 0x1a0   : > { %v3750_v51 = vpop.f32.mrb[79].mxu0  ;;  %v3013_v63 = vpop.eup %3012  ;;  %v1771_v52 = vadd.f32 1.0, %v3011_v11  ;;  %3026 = vpow2.f32 %v1728_v45  ;;  %v1682_v8 = vsub.f32 0.0, %v3758_v37  ;;  %v3765_v24 = vadd.f32 %v3524_v5, %v1609_v29 }
 0x1a1   : > { %v3015_v3 = vpop.eup %3014  ;;  %v1830_v41 = vmul.f32 %v3013_v63, %v3624_v33  ;;  %3028 = vrcp.f32 %v1768_v53  ;;  %v1730_v42 = vmul.f32 1.442695, %v1677_v48  ;;  %v1559_v33 = vadd.f32 %v3705_v35, %v1398_v14 }
 0x1a2   : > { %v3017_v36 = vpop.eup %3016  ;;  %v1828_v19 = vmul.f32 %v3015_v3, %v3628_v12  ;;  %3030 = vrcp.f32 %v1771_v52  ;;  %v2661_v12 = vadd.f32 %v3710_v47, %v3703_v54  ;;  %v1740_v4 = vmul.f32 1.442695, %v1682_v8 }
 0x1a3   : > { %v3019_v6 = vpop.eup %3018  ;;  %v1831_v55 = vmul.f32 %v3017_v36, %v3634_v9  ;;  %3032 = vpow2.f32 %v1734_v20  ;;  %v1612_v0 = vmul.f32 %v3518_v59, %v1559_v33  ;;  %v1390_v9 = vadd.f32 %v3667_v46, %v3453_v62 }
 0x1a4   : > { %v1769_v49 = vadd.f32 1.0, %v3019_v6  ;;  %3034 = vpow2.f32 %v1730_v42  ;;  %v3021_v45 = vpop.eup %3020  ;;  %v1680_v35 = vsub.f32 0.0, %v3765_v24  ;;  %v1403_v47 = vadd.f32 %v3729_v21, %v3459_v16 }
 0x1a5   : > { %v2387_v32 = vpack.c.bf16 %v1831_v55, %v1830_v41  ;;  %v1774_v13 = vadd.f32 1.0, %v3021_v45  ;;  %v3775_v2 = vadd.f32 %v3524_v5, %v1612_v0  ;;  %v1551_v54 = vadd.f32 %v3712_v44, %v1390_v9 }
 0x1a6   : > { %3036 = vrcp.f32 %v1769_v49  ;;  %v1736_v25 = vmul.f32 1.442695, %v1680_v35  ;;  %v1411_v62 = vadd.f32 %v2664_v50, %v3463_v28  ;;  %v2667_v46 = vadd.f32 %v2666_v15, %v2665_v26 }
 0x1a7   : > { %2435 = vst [vmem:[%s3663_s9 + $0x38] sm:$0xff] %v2387_v32   ;;  %3038 = vpow2.f32 %v1740_v4  ;;  %v1683_v1 = vsub.f32 0.0, %v3775_v2  ;;  %v1610_v18 = vmul.f32 %v3518_v59, %v1551_v54  ;;  %v1564_v21 = vadd.f32 %v3737_v58, %v1403_v47 }
 0x1a8   : > { %v3023_v39 = vpop.eup %3022  ;;  %3040 = vrcp.f32 %v1774_v13  ;;  %v1572_v16 = vadd.f32 %v3731_v60, %v1411_v62  ;;  %v1406_v41 = vadd.f32 %v2661_v12, %v3461_v22 }
 0x1a9   : > { %v3025_v14 = vpop.eup %3024  ;;  %v1829_v11 = vmul.f32 %v3023_v39, %v3646_v38  ;;  %3042 = vpow2.f32 %v1736_v25  ;;  %v1742_v15 = vmul.f32 1.442695, %v1683_v1  ;;  %v3788_v38 = vadd.f32 %v3524_v5, %v1610_v18 }
 0x1aa   : > { %v3027_v53 = vpop.eup %3026  ;;  %v1834_v44 = vmul.f32 %v3025_v14, %v3655_v31  ;;  %v1615_v56 = vmul.f32 %v3518_v59, %v1572_v16  ;;  %v1613_v10 = vmul.f32 %v3518_v59, %v1564_v21  ;;  %v1414_v31 = vadd.f32 %v2667_v46, %v3465_v34 }
 0x1ab   : > { %v3029_v27 = vpop.eup %3028  ;;  %v2382_v28 = vpack.c.bf16 %v1829_v11, %v1828_v19  ;;  %v1772_v26 = vadd.f32 1.0, %v3027_v53  ;;  %v1681_v58 = vsub.f32 0.0, %v3788_v38 }
 0x1ac   : > { %v3031_v63 = vpop.eup %3030  ;;  %v1832_v52 = vmul.f32 %v3029_v27, %v3671_v17  ;;  %v3799_v17 = vadd.f32 %v3524_v5, %v1615_v56  ;;  %v3802_v48 = vadd.f32 %v3524_v5, %v1613_v10  ;;  %v1575_v29 = vadd.f32 %v3743_v23, %v1414_v31 }
 0x1ad   : > { %v3033_v3 = vpop.eup %3032  ;;  %2434 = vst [vmem:[%s3663_s9 + $0x30] sm:$0xff] %v2382_v28   ;;  %v1835_v60 = vmul.f32 %v3031_v63, %v3677_v61  ;;  %3044 = vrcp.f32 %v1772_v26  ;;  %v1738_v19 = vmul.f32 1.442695, %v1681_v58  ;;  %v1567_v61 = vadd.f32 %v3750_v51, %v1406_v41 }
 0x1ae   : > { %v1775_v20 = vadd.f32 1.0, %v3033_v3  ;;  %3046 = vpow2.f32 %v1742_v15  ;;  %v3035_v36 = vpop.eup %3034  ;;  %v1686_v22 = vsub.f32 0.0, %v3799_v17  ;;  %v1684_v42 = vsub.f32 0.0, %v3802_v48 }
 0x1af   : > { %v2397_v34 = vpack.c.bf16 %v1835_v60, %v1834_v44  ;;  %v1773_v55 = vadd.f32 1.0, %v3035_v36  ;;  %v1616_v49 = vmul.f32 %v3518_v59, %v1575_v29  ;;  %v1614_v8 = vmul.f32 %v3518_v59, %v1567_v61 }
 0x1b0   : > { %v3037_v6 = vpop.eup %3036  ;;  %3048 = vrcp.f32 %v1775_v20  ;;  %v1748_v23 = vmul.f32 1.442695, %v1686_v22  ;;  %v1744_v51 = vmul.f32 1.442695, %v1684_v42 }
 0x1b1   : > { %2437 = vst [vmem:[%s3663_s9 + $0x48] sm:$0xff] %v2397_v34   ;;  %v1833_v33 = vmul.f32 %v3037_v6, %v3691_v43  ;;  %3050 = vpow2.f32 %v1738_v19  ;;  %v3039_v12 = vpop.eup %3038  ;;  %v3813_v9 = vadd.f32 %v3524_v5, %v1616_v49  ;;  %v3816_v45 = vadd.f32 %v3524_v5, %v1614_v8 }
 0x1b2   : > { %3052 = vrcp.f32 %v1773_v55  ;;  %v3041_v32 = vpop.eup %3040  ;;  %v1778_v35 = vadd.f32 1.0, %v3039_v12 }
 0x1b3   : > { %v2392_v0 = vpack.c.bf16 %v1833_v33, %v1832_v52  ;;  %v3043_v4 = vpop.eup %3042  ;;  %3054 = vpow2.f32 %v1748_v23  ;;  %v1687_v43 = vsub.f32 0.0, %v3813_v9  ;;  %v1685_v59 = vsub.f32 0.0, %v3816_v45 }
 0x1b4   : > { %3056 = vpow2.f32 %v1744_v51  ;;  %v1776_v39 = vadd.f32 1.0, %v3043_v4  ;;  %v1838_v46 = vmul.f32 %v3041_v32, %v3700_v30 }
 0x1b5   : > { %2436 = vst [vmem:[%s3663_s9 + $0x40] sm:$0xff] %v2392_v0   ;;  %v1750_v13 = vmul.f32 1.442695, %v1687_v43  ;;  %v1746_v54 = vmul.f32 1.442695, %v1685_v59  ;;  %3058 = vrcp.f32 %v1778_v35 }
 0x1b7   : > { %v3045_v50 = vpop.eup %3044  ;;  %3060 = vpow2.f32 %v1750_v13 }
 0x1b8   : > { %v3047_v47 = vpop.eup %3046  ;;  %3062 = vpow2.f32 %v1746_v54  ;;  %v1836_v18 = vmul.f32 %v3045_v50, %v3717_v57 }
 0x1b9   : > { %v1779_v25 = vadd.f32 1.0, %v3047_v47 }
 0x1ba   : > { %v3049_v5 = vpop.eup %3048 }
 0x1bb   : > { %v3051_v62 = vpop.eup %3050  ;;  %v1839_v14 = vmul.f32 %v3049_v5, %v3734_v40  ;;  %3064 = vrcp.f32 %v1779_v25 }
 0x1bc   : > { %v3053_v11 = vpop.eup %3052  ;;  %3066 = vrcp.f32 %v1776_v39  ;;  %v1777_v1 = vadd.f32 1.0, %v3051_v62 }
 0x1bd   : > { %v2407_v53 = vpack.c.bf16 %v1839_v14, %v1838_v46  ;;  %v1837_v44 = vmul.f32 %v3053_v11, %v3748_v7  ;;  %v3055_v16 = vpop.eup %3054 }
 0x1be   : > { %3068 = vrcp.f32 %v1777_v1  ;;  %v3057_v27 = vpop.eup %3056  ;;  %v1782_v28 = vadd.f32 1.0, %v3055_v16 }
 0x1bf   : > { %2439 = vst [vmem:[%s3663_s9 + $0x58] sm:$0xff] %v2407_v53   ;;  %v2402_v21 = vpack.c.bf16 %v1837_v44, %v1836_v18  ;;  %v1780_v26 = vadd.f32 1.0, %v3057_v27  ;;  %v3059_v30 = vpop.eup %3058 }
 0x1c0   : > { %3070 = vrcp.f32 %v1782_v28  ;;  %v1842_v56 = vmul.f32 %v3059_v30, %v3758_v37 }
 0x1c1   : > { %2438 = vst [vmem:[%s3663_s9 + $0x50] sm:$0xff] %v2402_v21   ;;  %v3061_v15 = vpop.eup %3060  ;;  %3072 = vrcp.f32 %v1780_v26 }
 0x1c2   : > { %v3063_v40 = vpop.eup %3062  ;;  %v1783_v63 = vadd.f32 1.0, %v3061_v15 }
 0x1c3   : > { %v1781_v57 = vadd.f32 1.0, %v3063_v40 }
 0x1c4   : > { %3074 = vrcp.f32 %v1783_v63 }
 0x1c5   : > { %v3065_v52 = vpop.eup %3064  ;;  %3076 = vrcp.f32 %v1781_v57 }
 0x1c6   : > { %v3067_v7 = vpop.eup %3066  ;;  %v1843_v10 = vmul.f32 %v3065_v52, %v3775_v2 }
 0x1c7   : > { %v1840_v60 = vmul.f32 %v3067_v7, %v3765_v24 }
 0x1c8   : > { %v3069_v31 = vpop.eup %3068  ;;  %v2417_v3 = vpack.c.bf16 %v1843_v10, %v1842_v56 }
 0x1c9   : > { %v1841_v58 = vmul.f32 %v3069_v31, %v3788_v38 }
 0x1ca   : > { %2441 = vst [vmem:[%s3663_s9 + $0x68] sm:$0xff] %v2417_v3   ;;  %v3071_v20 = vpop.eup %3070 }
 0x1cb   : > { %v2412_v41 = vpack.c.bf16 %v1841_v58, %v1840_v60  ;;  %v3073_v36 = vpop.eup %3072  ;;  %v1846_v2 = vmul.f32 %v3071_v20, %v3799_v17 }
 0x1cc   : > { %v1844_v24 = vmul.f32 %v3073_v36, %v3802_v48 }
 0x1cd   : > { %2440 = vst [vmem:[%s3663_s9 + $0x60] sm:$0xff] %v2412_v41  }
 0x1ce   : > { %v3075_v34 = vpop.eup %3074 }
 0x1cf   : > { %v3077_v37 = vpop.eup %3076  ;;  %v1847_v19 = vmul.f32 %v3075_v34, %v3813_v9 }
 0x1d0   : > { %v1845_v38 = vmul.f32 %v3077_v37, %v3816_v45 }
 0x1d1   : > { %v2427_v29 = vpack.c.bf16 %v1847_v19, %v1846_v2 }
 0x1d2   : > { %v2422_v61 = vpack.c.bf16 %v1845_v38, %v1844_v24 }
 0x1d3   : > { %2443 = vst [vmem:[%s3663_s9 + $0x78] sm:$0xff] %v2427_v29  }
 0x1d4   : > { %2442 = vst [vmem:[%s3663_s9 + $0x70] sm:$0xff] %v2422_v61  }
 0x1d5   : > { %3091 = shalt.err (!%p3088_p5)
}
 0x1d6   : > { %s3092_s10 = scalar_lea.hbm %s3842_s14, 2048  ;;  %s3096_s6 = scalar_lea.hbm %s3900_s4, 4096 }
 0x1d7   : > { %p3093_p6 = scmp.ne.s32.totalorder %s3842_s14, %s3092_s10  ;;  %p3097_p10 = scmp.lt.u32.totalorder %s3842_s14, %s3900_s4 }
 0x1d8   : > { %p3098_p11 = scmp.lt.u32.totalorder %s3096_s6, %s3092_s10  ;;  %p3100_p13 = scmp.lt.u32.totalorder %s3092_s10, %s3842_s14 }
 0x1d9   : > { %p3094_p7 = pnand %p3093_p6, %p3226_p4 }
 0x1da   : > { %p3099_p12 = por %p3098_p11, %p3097_p10 }
 0x1db   : > { %p3095_p9 = pneg %p3094_p7 }
 0x1dc   : > { %p3101_p0 = por %p3100_p13, %p3099_p12 }
 0x1de   : > { %p3102_p1 = pnand %p3101_p0, %p3095_p9 }
 0x1e0   : > { %3105 = shalt.err (!%p3102_p1)
}
 0x1e1   : > { %s3159_s9 = smov 64   ;;  %s3160_s5 = smov 4  }
 0x1e2   : > { %2745 = dma.vmem_to_hbm [thread:$0]  (%p3226_p4), %s3844_s11, 2048, %s3842_s14, %s3850_s18, %s3159_s9, %s3159_s9, %s3160_s5  }
 0x1e3 PF: > { %p2751_p2 = scmp.ge.s32.totalorder %s3156_s20, 2  ;;  %s2038_s12 = sand.u32 1, %s3136_s15  }
 0x1e4   : > { %s2039_s13 = scalar_lea.sflag [#allocation3], %s2038_s12 }
 0x1e5   : > { %p2748_p3 = pnand %p2751_p2, %p3233_p8 }
 0x1e7   : > { %3131 = dma.done.wait (!%p2748_p3), %s2039_s13, 2048  }
 0x1e8   : > { %3133 = vsyncadd (!%p2748_p3), %s2039_s13, 4294965248  ;;  %s17_s20 = sadd.s32 1, %s3156_s20   ;;  %s3903_s15 = smov %s3140_s16 }
 0x1e9   : > { %p14_p5 = scmp.ge.s32.totalorder %s17_s20, 4   ;;  %s3904_s16 = smov %s3144_s17 }
 0x1ea   : > { %s3905_s17 = smov %s3239_s28  ;;  %s3906_s18 = smov %s3152_s19 }
 0x1eb   : > { %s3907_s19 = smov %s3909_s23  ;;  %16 = sbr.rel (!%p14_p5) target bundleno = 4 (0x4), region = 80 }
 0x1f2   :  { %2044 = vsyncpa [#allocation3], 1 }
 0x1f3   :  { %2046 = vsyncpa [#allocation3 + $0x1], 1 }

</bundles_post_ra>
